<compile_context>
chip_gen: v5e
topology: v5e:2x2
jax: 0.10.0
libtpu: 0.0.40
codegen_flags: <defaults>
</compile_context>

<pallas_src>
import functools

import jax
import jax.numpy as jnp
from jax import lax
from jax.experimental import pallas as pl
from jax.experimental.pallas import tpu as pltpu

LEAKY_SLOPE = 0.01  # torch.nn.LeakyReLU default
VMEM_LIMIT = 32 * 1024 * 1024


def _ceil_to(v, m):
    return ((v + m - 1) // m) * m


def _node_tile(np_):
    for t in (512, 256, 128):
        if np_ % t == 0:
            return t
    return 128  # unreachable: np_ is always a multiple of 128


def _leaky(h):
    return jnp.where(h > 0, h, LEAKY_SLOPE * h)


# ---------------------------------------------------------------------------
# Kernel 1: neighbor-projection (row-tiled, fully parallel)
#   x      : (NP, K)    node features (padded, f32)
#   w_nbr  : (K, HP)    neighbor weight (padded, f32)
# output:
#   z      : (NP, HP)   bf16  = x @ W_nbr   (fed to the adjacency matmul)
# ---------------------------------------------------------------------------
def conv_project_kernel(x_ref, wn_ref, z_ref):
    z_ref[...] = jnp.dot(
        x_ref[...].astype(jnp.bfloat16),
        wn_ref[...].astype(jnp.bfloat16),
        preferred_element_type=jnp.float32,
    ).astype(z_ref.dtype)


def conv_project(x, w_nbr):
    np_, kx = x.shape
    hp = w_nbr.shape[1]
    tm = _node_tile(np_)
    return pl.pallas_call(
        conv_project_kernel,
        out_shape=jax.ShapeDtypeStruct((np_, hp), jnp.bfloat16),
        grid=(np_ // tm,),
        in_specs=[
            pl.BlockSpec((tm, kx), lambda i: (i, 0)),
            pl.BlockSpec((kx, hp), lambda i: (0, 0)),
        ],
        out_specs=pl.BlockSpec((tm, hp), lambda i: (i, 0)),
        compiler_params=pltpu.CompilerParams(
            dimension_semantics=("parallel",),
            vmem_limit_bytes=VMEM_LIMIT),
        cost_estimate=pl.CostEstimate(
            flops=2 * np_ * kx * hp,
            transcendentals=0,
            bytes_accessed=4 * np_ * kx + 4 * kx * hp + 2 * np_ * hp),
    )(x, w_nbr)


# ---------------------------------------------------------------------------
# Kernel 2: adjacency aggregation + fused self/edge/bias term + LeakyReLU
#   adj : (NP, NP) bf16, z : (NP, HP) bf16
#   x : (NP, K) f32, e_agg : (NP, FeP) f32, W_self : (K, HP), W_edge : (FeP, HP)
#   out = LeakyReLU(adj @ z + x @ W_self + e_agg @ W_edge + b)
# grid = (dest-node tiles [parallel], src-node tiles [arbitrary, reduction])
# x / e_agg / weights have k-invariant index maps -> fetched once per dest tile.
# ---------------------------------------------------------------------------
def conv_aggregate_kernel(adj_ref, z_ref, x_ref, eagg_ref, ws_ref, we_ref,
                          b_ref, o_ref, acc_ref):
    k = pl.program_id(1)

    @pl.when(k == 0)
    def _():
        acc_ref[...] = jnp.zeros_like(acc_ref)

    acc_ref[...] += jnp.dot(adj_ref[...], z_ref[...],
                            preferred_element_type=jnp.float32)

    @pl.when(k == pl.num_programs(1) - 1)
    def _():
        se = (jnp.dot(x_ref[...], ws_ref[...],
                      preferred_element_type=jnp.float32)
              + jnp.dot(eagg_ref[...], we_ref[...],
                        preferred_element_type=jnp.float32)
              + b_ref[...])
        o_ref[...] = _leaky(acc_ref[...] + se)


def conv_aggregate(adj, z, x, e_agg, w_self, w_edge, b):
    np_ = adj.shape[0]
    hp = z.shape[1]
    kx = x.shape[1]
    fe_p = e_agg.shape[1]
    t = _node_tile(np_)
    return pl.pallas_call(
        conv_aggregate_kernel,
        out_shape=jax.ShapeDtypeStruct((np_, hp), jnp.float32),
        grid=(np_ // t, np_ // t),
        in_specs=[
            pl.BlockSpec((t, t), lambda i, k: (i, k)),
            pl.BlockSpec((t, hp), lambda i, k: (k, 0)),
            pl.BlockSpec((t, kx), lambda i, k: (i, 0)),
            pl.BlockSpec((t, fe_p), lambda i, k: (i, 0)),
            pl.BlockSpec((kx, hp), lambda i, k: (0, 0)),
            pl.BlockSpec((fe_p, hp), lambda i, k: (0, 0)),
            pl.BlockSpec((1, hp), lambda i, k: (0, 0)),
        ],
        out_specs=pl.BlockSpec((t, hp), lambda i, k: (i, 0)),
        scratch_shapes=[pltpu.VMEM((t, hp), jnp.float32)],
        compiler_params=pltpu.CompilerParams(
            dimension_semantics=("parallel", "arbitrary"),
            vmem_limit_bytes=VMEM_LIMIT),
        cost_estimate=pl.CostEstimate(
            flops=2 * np_ * np_ * hp + 2 * np_ * (kx + fe_p) * hp,
            transcendentals=0,
            bytes_accessed=(2 * np_ * np_ + 2 * np_ * hp * (np_ // t)
                            + 4 * np_ * (kx + fe_p) + 4 * (kx + fe_p + 1) * hp
                            + 4 * np_ * hp)),
    )(adj, z, x, e_agg, w_self, w_edge, b)


# ---------------------------------------------------------------------------
# Kernel 3: head = masked global mean pool + Linear/LeakyReLU + Linear
#           + log_softmax (padded class lanes masked out).
# Real node count arrives as an SMEM scalar (scalar prefetch) so the mean is
# correct despite node-axis padding.
# ---------------------------------------------------------------------------
def head_kernel(n_ref, x_ref, w1_ref, b1_ref, w2_ref, b2_ref, o_ref,
                pooled_ref, *, num_classes):
    i = pl.program_id(0)
    tm = x_ref.shape[0]

    @pl.when(i == 0)
    def _():
        pooled_ref[...] = jnp.zeros_like(pooled_ref)

    rows = i * tm + lax.broadcasted_iota(jnp.int32, (tm, 1), 0)
    xm = jnp.where(rows < n_ref[0], x_ref[...], 0.0)
    pooled_ref[...] += jnp.sum(xm, axis=0, keepdims=True)

    @pl.when(i == pl.num_programs(0) - 1)
    def _():
        inv_n = 1.0 / n_ref[0].astype(jnp.float32)
        pooled = pooled_ref[...] * inv_n                                  # (1, HP)
        h = jnp.dot(pooled, w1_ref[...],
                    preferred_element_type=jnp.float32) + b1_ref[...]
        h = _leaky(h)
        logits = jnp.dot(h, w2_ref[...],
                         preferred_element_type=jnp.float32) + b2_ref[...]
        lane = lax.broadcasted_iota(jnp.int32, logits.shape, 1)
        logits = jnp.where(lane < num_classes, logits, -1e30)
        m = jnp.max(logits, axis=1, keepdims=True)
        lse = jnp.log(jnp.sum(jnp.exp(logits - m), axis=1, keepdims=True)) + m
        o_ref[...] = logits - lse


def head_call(x, n_arr, w1, b1, w2, b2, *, num_classes):
    np_, hp = x.shape
    cp = w2.shape[1]
    tm = _node_tile(np_)
    kernel = functools.partial(head_kernel, num_classes=num_classes)
    return pl.pallas_call(
        kernel,
        out_shape=jax.ShapeDtypeStruct((1, cp), jnp.float32),
        grid_spec=pltpu.PrefetchScalarGridSpec(
            num_scalar_prefetch=1,
            grid=(np_ // tm,),
            in_specs=[
                pl.BlockSpec((tm, hp), lambda i, n: (i, 0)),
                pl.BlockSpec((hp, hp), lambda i, n: (0, 0)),
                pl.BlockSpec((1, hp), lambda i, n: (0, 0)),
                pl.BlockSpec((hp, cp), lambda i, n: (0, 0)),
                pl.BlockSpec((1, cp), lambda i, n: (0, 0)),
            ],
            out_specs=pl.BlockSpec((1, cp), lambda i, n: (0, 0)),
            scratch_shapes=[pltpu.VMEM((1, hp), jnp.float32)]),
        compiler_params=pltpu.CompilerParams(
            dimension_semantics=("arbitrary",),
            vmem_limit_bytes=VMEM_LIMIT),
        cost_estimate=pl.CostEstimate(
            flops=2 * np_ * hp + 2 * hp * hp + 2 * hp * cp,
            transcendentals=cp,
            bytes_accessed=4 * np_ * hp + 4 * hp * (hp + cp)),
    )(n_arr, x, w1, b1, w2, b2)


# ---------------------------------------------------------------------------
# Plain-JAX glue: scatter edges into dense padded adjacency / edge aggregates,
# pad inputs and weights to lane-dense shapes.
# ---------------------------------------------------------------------------
def build_dense_graph(edge_index, edge_attr, num_nodes, np_, fe_p):
    src, dst = edge_index[0], edge_index[1]
    adj = jnp.zeros((np_, np_), jnp.float32).at[dst, src].add(1.0)
    ea = jnp.zeros((edge_attr.shape[0], fe_p), jnp.float32)
    ea = ea.at[:, :edge_attr.shape[1]].set(edge_attr)
    e_agg = jnp.zeros((np_, fe_p), jnp.float32).at[dst].add(ea)
    # counts are small integers -> exactly representable in bf16
    return adj.astype(jnp.bfloat16), e_agg


def _pad2(a, rows, cols):
    return jnp.zeros((rows, cols), jnp.float32).at[:a.shape[0], :a.shape[1]].set(a)


def pad_params(params, hp, cp, fe_p):
    conv = []
    for (w_self, w_nbr, w_edge, b) in params["conv"]:
        kp = _ceil_to(w_self.shape[0], 128)
        conv.append((_pad2(w_self, kp, hp), _pad2(w_nbr, kp, hp),
                     _pad2(w_edge, fe_p, hp), _pad2(b, 1, hp)))
    (w1, b1), (w2, b2) = params["linear"]
    lin = ((_pad2(w1, hp, hp), _pad2(b1, 1, hp)),
           (_pad2(w2, hp, cp), _pad2(b2, 1, cp)))
    return {"conv": conv, "linear": lin}


@functools.partial(jax.jit, static_argnames=("num_nodes", "num_classes"))
def gnn_forward(params, x, edge_index, edge_attr, *, num_nodes, num_classes):
    fin = x.shape[1]
    fe = edge_attr.shape[1]
    hidden = params["conv"][0][0].shape[1]

    np_ = _ceil_to(num_nodes, 128)
    fin_p = _ceil_to(fin, 128)
    fe_p = _ceil_to(fe, 128)
    hp = _ceil_to(hidden, 128)
    cp = _ceil_to(num_classes, 128)

    x_p = jnp.zeros((np_, fin_p), jnp.float32).at[:num_nodes, :fin].set(x)
    adj, e_agg = build_dense_graph(edge_index, edge_attr, num_nodes, np_, fe_p)
    padded = pad_params(params, hp, cp, fe_p)
    n_arr = jnp.full((1,), num_nodes, jnp.int32)

    h = x_p
    for (w_self, w_nbr, w_edge, b) in padded["conv"]:
        z = conv_project(h, w_nbr)
        h = conv_aggregate(adj, z, h, e_agg, w_self, w_edge, b)

    (w1, b1), (w2, b2) = padded["linear"]
    logp = head_call(h, n_arr, w1, b1, w2, b2, num_classes=num_classes)
    return logp[:, :num_classes]


# ---------------------------------------------------------------------------
# Deterministic parameter init (real / unpadded sizes, PyTorch-equivalent)
# ---------------------------------------------------------------------------
def init_params(key, num_node_features, num_edge_features, num_classes,
                hidden_dim, num_conv_layers):
    def dense(k, shape):
        return 0.1 * jax.random.normal(k, shape, jnp.float32)

    keys = jax.random.split(key, 4 * num_conv_layers + 4)
    conv_params = []
    fin = num_node_features
    ki = 0
    for _ in range(num_conv_layers):
        w_self = dense(keys[ki + 0], (fin, hidden_dim))
        w_nbr = dense(keys[ki + 1], (fin, hidden_dim))
        w_edge = dense(keys[ki + 2], (num_edge_features, hidden_dim))
        bias = dense(keys[ki + 3], (1, hidden_dim))
        conv_params.append((w_self, w_nbr, w_edge, bias))
        fin = hidden_dim
        ki += 4
    w1 = dense(keys[ki + 0], (hidden_dim, hidden_dim))
    b1 = dense(keys[ki + 1], (1, hidden_dim))
    w2 = dense(keys[ki + 2], (hidden_dim, num_classes))
    b2 = dense(keys[ki + 3], (1, num_classes))
    return {"conv": conv_params, "linear": [(w1, b1), (w2, b2)]}


# Pure-JAX reference (unpadded, f32) for correctness check.
def reference_forward(params, x, edge_index, edge_attr, num_nodes):
    src, dst = edge_index[0], edge_index[1]
    adj = jnp.zeros((num_nodes, num_nodes), jnp.float32).at[dst, src].add(1.0)
    e_agg = jnp.zeros((num_nodes, edge_attr.shape[1]), jnp.float32).at[dst].add(edge_attr)
    h = x
    for (w_self, w_nbr, w_edge, b) in params["conv"]:
        out = h @ w_self + (adj @ h) @ w_nbr + e_agg @ w_edge + b
        h = _leaky(out)
    pooled = jnp.mean(h, axis=0, keepdims=True)
    (w1, b1), (w2, b2) = params["linear"]
    z = _leaky(pooled @ w1 + b1)
    logits = z @ w2 + b2
    return jax.nn.log_softmax(logits, axis=1)


if __name__ == "__main__":
    num_nodes = 16
    num_node_features = 8
    num_edge_features = 4
    num_classes = 3
    hidden_dim = 32
    num_conv_layers = 2
    num_edges = 32

    root = jax.random.PRNGKey(0)
    k_x, k_e, k_src, k_dst, k_p = jax.random.split(root, 5)

    x = jax.random.normal(k_x, (num_nodes, num_node_features), jnp.float32)
    edge_attr = jax.random.normal(k_e, (num_edges, num_edge_features), jnp.float32)
    src = jax.random.randint(k_src, (num_edges,), 0, num_nodes, jnp.int32)
    dst = jax.random.randint(k_dst, (num_edges,), 0, num_nodes, jnp.int32)
    edge_index = jnp.stack([src, dst], axis=0)  # (2, E)

    params = init_params(k_p, num_node_features, num_edge_features,
                         num_classes, hidden_dim, num_conv_layers)

    out = gnn_forward(params, x, edge_index, edge_attr,
                      num_nodes=num_nodes, num_classes=num_classes)
    out = jax.block_until_ready(out)

    assert out.shape == (1, num_classes)
    # log_softmax rows must sum (in prob space) to ~1
    assert abs(float(jnp.sum(jnp.exp(out))) - 1.0) < 1e-4
    # match the unpadded f32 reference (bf16 adjacency/z introduce tiny noise)
    ref = reference_forward(params, x, edge_index, edge_attr, num_nodes)
    assert jnp.allclose(out, ref, atol=5e-2, rtol=5e-2), (out, ref)
    print("KERNEL_OK")
</pallas_src>

<mosaic_0001>
module attributes {stable_mosaic.version = 11 : i64} {
  func.func @conv_project_kernel(%arg0: i32, %arg1: memref<128x128xf32, #tpu.memory_space<vmem>>, %arg2: memref<128x128xf32, #tpu.memory_space<vmem>>, %arg3: memref<128x128xbf16, #tpu.memory_space<vmem>>) attributes {dimension_semantics = [#tpu.dimension_semantics<parallel>], iteration_bounds = array<i64: 1>, scalar_prefetch = 0 : i64, scratch_operands = 0 : i64, tpu.core_type = #tpu.core_type<tc>, window_params = [{transform_indices = @transform_0, window_bounds = array<i64: 128, 128>}, {pipeline_mode = #tpu.pipeline_mode<synchronous>, transform_indices = @transform_1, window_bounds = array<i64: 128, 128>}, {transform_indices = @transform_2, window_bounds = array<i64: 128, 128>}]} {
    %c0 = arith.constant 0 : index
    %c0_0 = arith.constant 0 : index
    %0 = vector.load %arg1[%c0, %c0_0] : memref<128x128xf32, #tpu.memory_space<vmem>>, vector<128x128xf32>
    %1 = arith.truncf %0 : vector<128x128xf32> to vector<128x128xbf16>
    %c0_1 = arith.constant 0 : index
    %c0_2 = arith.constant 0 : index
    %2 = vector.load %arg2[%c0_1, %c0_2] : memref<128x128xf32, #tpu.memory_space<vmem>>, vector<128x128xf32>
    %3 = arith.truncf %2 : vector<128x128xf32> to vector<128x128xbf16>
    %cst = arith.constant dense<0.000000e+00> : vector<128x128xf32>
    %4 = tpu.matmul %1, %3, %cst {dimension_numbers = #tpu.dot_dimension_numbers<[1], [0], [0], [1], [0, 0, 1, 1], [], []>} : vector<128x128xbf16>, vector<128x128xbf16>, vector<128x128xf32> -> vector<128x128xf32>
    %5 = arith.truncf %4 : vector<128x128xf32> to vector<128x128xbf16>
    %c0_3 = arith.constant 0 : index
    %c0_4 = arith.constant 0 : index
    %6 = vector.load %arg3[%c0_3, %c0_4] : memref<128x128xbf16, #tpu.memory_space<vmem>>, vector<128x128xbf16>
    tpu.vector_store %arg3[%c0_3, %c0_4], %5 {strides = array<i32>} : memref<128x128xbf16, #tpu.memory_space<vmem>>, vector<128x128xbf16>,
    return
  }
  func.func @transform_0(%arg0: i32) -> (i32, i32) {
    %c0_i32 = arith.constant 0 : i32
    %c0_i32_0 = arith.constant 0 : i32
    return %arg0, %c0_i32 : i32, i32
  }
  func.func @transform_1(%arg0: i32) -> (i32, i32) {
    %c0_i32 = arith.constant 0 : i32
    %c0_i32_0 = arith.constant 0 : i32
    %c0_i32_1 = arith.constant 0 : i32
    return %c0_i32, %c0_i32_0 : i32, i32
  }
  func.func @transform_2(%arg0: i32) -> (i32, i32) {
    %c0_i32 = arith.constant 0 : i32
    %c0_i32_0 = arith.constant 0 : i32
    return %arg0, %c0_i32 : i32, i32
  }
}

module attributes {stable_mosaic.version = 11 : i64} {
  func.func @conv_aggregate_kernel(%arg0: i32, %arg1: i32, %arg2: memref<128x128xbf16, #tpu.memory_space<vmem>>, %arg3: memref<128x128xbf16, #tpu.memory_space<vmem>>, %arg4: memref<128x128xf32, #tpu.memory_space<vmem>>, %arg5: memref<128x128xf32, #tpu.memory_space<vmem>>, %arg6: memref<128x128xf32, #tpu.memory_space<vmem>>, %arg7: memref<128x128xf32, #tpu.memory_space<vmem>>, %arg8: memref<1x128xf32, #tpu.memory_space<vmem>>, %arg9: memref<128x128xf32, #tpu.memory_space<vmem>>, %arg10: memref<128x128xf32, #tpu.memory_space<vmem>>) attributes {dimension_semantics = [#tpu.dimension_semantics<parallel>, #tpu.dimension_semantics<arbitrary>], iteration_bounds = array<i64: 1, 1>, scalar_prefetch = 0 : i64, scratch_operands = 1 : i64, tpu.core_type = #tpu.core_type<tc>, window_params = [{transform_indices = @transform_0, window_bounds = array<i64: 128, 128>}, {transform_indices = @transform_1, window_bounds = array<i64: 128, 128>}, {transform_indices = @transform_2, window_bounds = array<i64: 128, 128>}, {transform_indices = @transform_3, window_bounds = array<i64: 128, 128>}, {pipeline_mode = #tpu.pipeline_mode<synchronous>, transform_indices = @transform_4, window_bounds = array<i64: 128, 128>}, {pipeline_mode = #tpu.pipeline_mode<synchronous>, transform_indices = @transform_5, window_bounds = array<i64: 128, 128>}, {pipeline_mode = #tpu.pipeline_mode<synchronous>, transform_indices = @transform_6, window_bounds = array<i64: 1, 128>}, {transform_indices = @transform_7, window_bounds = array<i64: 128, 128>}]} {
    %c0_i32 = arith.constant 0 : i32
    %0 = arith.cmpi eq, %arg1, %c0_i32 : i32
    %1 = arith.extui %0 : i1 to i32
    %c0_i32_0 = arith.constant 0 : i32
    %2 = arith.cmpi ne, %1, %c0_i32_0 : i32
    scf.if %2 {
      %cst_10 = arith.constant 0.000000e+00 : f32
      %12 = vector.broadcast %cst_10 : f32 to vector<128x128xf32>
      %c0_11 = arith.constant 0 : index
      %c0_12 = arith.constant 0 : index
      %13 = vector.load %arg10[%c0_11, %c0_12] : memref<128x128xf32, #tpu.memory_space<vmem>>, vector<128x128xf32>
      tpu.vector_store %arg10[%c0_11, %c0_12], %12 {strides = array<i32>} : memref<128x128xf32, #tpu.memory_space<vmem>>, vector<128x128xf32>,
    } else {
    }
    %c0 = arith.constant 0 : index
    %c0_1 = arith.constant 0 : index
    %3 = vector.load %arg10[%c0, %c0_1] : memref<128x128xf32, #tpu.memory_space<vmem>>, vector<128x128xf32>
    %c0_2 = arith.constant 0 : index
    %c0_3 = arith.constant 0 : index
    %4 = vector.load %arg2[%c0_2, %c0_3] : memref<128x128xbf16, #tpu.memory_space<vmem>>, vector<128x128xbf16>
    %c0_4 = arith.constant 0 : index
    %c0_5 = arith.constant 0 : index
    %5 = vector.load %arg3[%c0_4, %c0_5] : memref<128x128xbf16, #tpu.memory_space<vmem>>, vector<128x128xbf16>
    %cst = arith.constant dense<0.000000e+00> : vector<128x128xf32>
    %6 = tpu.matmul %4, %5, %cst {dimension_numbers = #tpu.dot_dimension_numbers<[1], [0], [0], [1], [0, 0, 1, 1], [], []>} : vector<128x128xbf16>, vector<128x128xbf16>, vector<128x128xf32> -> vector<128x128xf32>
    %7 = arith.addf %3, %6 : vector<128x128xf32>
    %c0_6 = arith.constant 0 : index
    %c0_7 = arith.constant 0 : index
    %8 = vector.load %arg10[%c0_6, %c0_7] : memref<128x128xf32, #tpu.memory_space<vmem>>, vector<128x128xf32>
    tpu.vector_store %arg10[%c0_6, %c0_7], %7 {strides = array<i32>} : memref<128x128xf32, #tpu.memory_space<vmem>>, vector<128x128xf32>,
    %c0_i32_8 = arith.constant 0 : i32
    %9 = arith.cmpi eq, %arg1, %c0_i32_8 : i32
    %10 = arith.extui %9 : i1 to i32
    %c0_i32_9 = arith.constant 0 : i32
    %11 = arith.cmpi ne, %10, %c0_i32_9 : i32
    scf.if %11 {
      %c0_10 = arith.constant 0 : index
      %c0_11 = arith.constant 0 : index
      %12 = vector.load %arg4[%c0_10, %c0_11] : memref<128x128xf32, #tpu.memory_space<vmem>>, vector<128x128xf32>
      %c0_12 = arith.constant 0 : index
      %c0_13 = arith.constant 0 : index
      %13 = vector.load %arg6[%c0_12, %c0_13] : memref<128x128xf32, #tpu.memory_space<vmem>>, vector<128x128xf32>
      %cst_14 = arith.constant dense<0.000000e+00> : vector<128x128xf32>
      %14 = tpu.matmul %12, %13, %cst_14 {dimension_numbers = #tpu.dot_dimension_numbers<[1], [0], [0], [1], [0, 0, 1, 1], [], []>} : vector<128x128xf32>, vector<128x128xf32>, vector<128x128xf32> -> vector<128x128xf32>
      %c0_15 = arith.constant 0 : index
      %c0_16 = arith.constant 0 : index
      %15 = vector.load %arg5[%c0_15, %c0_16] : memref<128x128xf32, #tpu.memory_space<vmem>>, vector<128x128xf32>
      %c0_17 = arith.constant 0 : index
      %c0_18 = arith.constant 0 : index
      %16 = vector.load %arg7[%c0_17, %c0_18] : memref<128x128xf32, #tpu.memory_space<vmem>>, vector<128x128xf32>
      %cst_19 = arith.constant dense<0.000000e+00> : vector<128x128xf32>
      %17 = tpu.matmul %15, %16, %cst_19 {dimension_numbers = #tpu.dot_dimension_numbers<[1], [0], [0], [1], [0, 0, 1, 1], [], []>} : vector<128x128xf32>, vector<128x128xf32>, vector<128x128xf32> -> vector<128x128xf32>
      %18 = arith.addf %14, %17 : vector<128x128xf32>
      %c0_20 = arith.constant 0 : index
      %c0_21 = arith.constant 0 : index
      %19 = vector.load %arg8[%c0_20, %c0_21] : memref<1x128xf32, #tpu.memory_space<vmem>>, vector<1x128xf32>
      %20 = vector.broadcast %19 : vector<1x128xf32> to vector<128x128xf32>
      %21 = arith.addf %18, %20 : vector<128x128xf32>
      %c0_22 = arith.constant 0 : index
      %c0_23 = arith.constant 0 : index
      %22 = vector.load %arg10[%c0_22, %c0_23] : memref<128x128xf32, #tpu.memory_space<vmem>>, vector<128x128xf32>
      %23 = arith.addf %22, %21 : vector<128x128xf32>
      %cst_24 = arith.constant 0.000000e+00 : f32
      %24 = vector.broadcast %cst_24 : f32 to vector<128x128xf32>
      %25 = arith.cmpf ogt, %23, %24 : vector<128x128xf32>
      %cst_25 = arith.constant 0.00999999977 : f32
      %26 = vector.broadcast %cst_25 : f32 to vector<128x128xf32>
      %27 = arith.mulf %26, %23 : vector<128x128xf32>
      %28 = arith.select %25, %23, %27 : vector<128x128xi1>, vector<128x128xf32>
      %c0_26 = arith.constant 0 : index
      %c0_27 = arith.constant 0 : index
      %29 = vector.load %arg9[%c0_26, %c0_27] : memref<128x128xf32, #tpu.memory_space<vmem>>, vector<128x128xf32>
      tpu.vector_store %arg9[%c0_26, %c0_27], %28 {strides = array<i32>} : memref<128x128xf32, #tpu.memory_space<vmem>>, vector<128x128xf32>,
    } else {
    }
    return
  }
  func.func @transform_0(%arg0: i32, %arg1: i32) -> (i32, i32) {
    %c0_i32 = arith.constant 0 : i32
    return %arg0, %arg1 : i32, i32
  }
  func.func @transform_1(%arg0: i32, %arg1: i32) -> (i32, i32) {
    %c0_i32 = arith.constant 0 : i32
    %c0_i32_0 = arith.constant 0 : i32
    return %arg1, %c0_i32 : i32, i32
  }
  func.func @transform_2(%arg0: i32, %arg1: i32) -> (i32, i32) {
    %c0_i32 = arith.constant 0 : i32
    %c0_i32_0 = arith.constant 0 : i32
    return %arg0, %c0_i32 : i32, i32
  }
  func.func @transform_3(%arg0: i32, %arg1: i32) -> (i32, i32) {
    %c0_i32 = arith.constant 0 : i32
    %c0_i32_0 = arith.constant 0 : i32
    return %arg0, %c0_i32 : i32, i32
  }
  func.func @transform_4(%arg0: i32, %arg1: i32) -> (i32, i32) {
    %c0_i32 = arith.constant 0 : i32
    %c0_i32_0 = arith.constant 0 : i32
    %c0_i32_1 = arith.constant 0 : i32
    return %c0_i32, %c0_i32_0 : i32, i32
  }
  func.func @transform_5(%arg0: i32, %arg1: i32) -> (i32, i32) {
    %c0_i32 = arith.constant 0 : i32
    %c0_i32_0 = arith.constant 0 : i32
    %c0_i32_1 = arith.constant 0 : i32
    return %c0_i32, %c0_i32_0 : i32, i32
  }
  func.func @transform_6(%arg0: i32, %arg1: i32) -> (i32, i32) {
    %c0_i32 = arith.constant 0 : i32
    %c0_i32_0 = arith.constant 0 : i32
    %c0_i32_1 = arith.constant 0 : i32
    return %c0_i32, %c0_i32_0 : i32, i32
  }
  func.func @transform_7(%arg0: i32, %arg1: i32) -> (i32, i32) {
    %c0_i32 = arith.constant 0 : i32
    %c0_i32_0 = arith.constant 0 : i32
    return %arg0, %c0_i32 : i32, i32
  }
}

module attributes {stable_mosaic.version = 11 : i64} {
  func.func @head_kernel(%arg0: i32, %arg1: memref<1xi32, #tpu.memory_space<smem>>, %arg2: memref<128x128xf32, #tpu.memory_space<vmem>>, %arg3: memref<128x128xf32, #tpu.memory_space<vmem>>, %arg4: memref<1x128xf32, #tpu.memory_space<vmem>>, %arg5: memref<128x128xf32, #tpu.memory_space<vmem>>, %arg6: memref<1x128xf32, #tpu.memory_space<vmem>>, %arg7: memref<1x128xf32, #tpu.memory_space<vmem>>, %arg8: memref<1x128xf32, #tpu.memory_space<vmem>>) attributes {dimension_semantics = [#tpu.dimension_semantics<arbitrary>], iteration_bounds = array<i64: 1>, scalar_prefetch = 1 : i64, scratch_operands = 1 : i64, tpu.core_type = #tpu.core_type<tc>, window_params = [{transform_indices = @transform_0, window_bounds = array<i64: 128, 128>}, {pipeline_mode = #tpu.pipeline_mode<synchronous>, transform_indices = @transform_1, window_bounds = array<i64: 128, 128>}, {pipeline_mode = #tpu.pipeline_mode<synchronous>, transform_indices = @transform_2, window_bounds = array<i64: 1, 128>}, {pipeline_mode = #tpu.pipeline_mode<synchronous>, transform_indices = @transform_3, window_bounds = array<i64: 128, 128>}, {pipeline_mode = #tpu.pipeline_mode<synchronous>, transform_indices = @transform_4, window_bounds = array<i64: 1, 128>}, {pipeline_mode = #tpu.pipeline_mode<synchronous>, transform_indices = @transform_5, window_bounds = array<i64: 1, 128>}]} {
    %c0_i32 = arith.constant 0 : i32
    %0 = arith.cmpi eq, %arg0, %c0_i32 : i32
    %1 = arith.extui %0 : i1 to i32
    %c0_i32_0 = arith.constant 0 : i32
    %2 = arith.cmpi ne, %1, %c0_i32_0 : i32
    scf.if %2 {
      %cst_10 = arith.constant 0.000000e+00 : f32
      %23 = vector.broadcast %cst_10 : f32 to vector<1x128xf32>
      %c0_11 = arith.constant 0 : index
      %c0_12 = arith.constant 0 : index
      %24 = vector.load %arg8[%c0_11, %c0_12] : memref<1x128xf32, #tpu.memory_space<vmem>>, vector<1x128xf32>
      tpu.vector_store %arg8[%c0_11, %c0_12], %23 {strides = array<i32>} : memref<1x128xf32, #tpu.memory_space<vmem>>, vector<1x128xf32>,
    } else {
    }
    %c128_i32 = arith.constant 128 : i32
    %3 = arith.muli %arg0, %c128_i32 : i32
    %4 = tpu.iota {dimensions = array<i32: 0>} : vector<128x1xi32>
    %5 = vector.broadcast %3 : i32 to vector<128x1xi32>
    %6 = arith.addi %5, %4 : vector<128x1xi32>
    %c0 = arith.constant 0 : index
    %7 = memref.load %arg1[%c0] : memref<1xi32, #tpu.memory_space<smem>>
    %8 = vector.broadcast %7 : i32 to vector<128x1xi32>
    %9 = arith.cmpi slt, %6, %8 : vector<128x1xi32>
    %c0_1 = arith.constant 0 : index
    %c0_2 = arith.constant 0 : index
    %10 = vector.load %arg2[%c0_1, %c0_2] : memref<128x128xf32, #tpu.memory_space<vmem>>, vector<128x128xf32>
    %cst = arith.constant 0.000000e+00 : f32
    %11 = vector.shape_cast %9 : vector<128x1xi1> to vector<128x1xi1>
    %12 = vector.broadcast %11 : vector<128x1xi1> to vector<128x128xi1>
    %13 = vector.broadcast %cst : f32 to vector<128x128xf32>
    %14 = arith.select %12, %10, %13 : vector<128x128xi1>, vector<128x128xf32>
    %c0_3 = arith.constant 0 : index
    %c0_4 = arith.constant 0 : index
    %15 = vector.load %arg8[%c0_3, %c0_4] : memref<1x128xf32, #tpu.memory_space<vmem>>, vector<1x128xf32>
    %cst_5 = arith.constant dense<0.000000e+00> : vector<128xf32>
    %16 = vector.multi_reduction <add>, %14, %cst_5 [0] : vector<128x128xf32> to vector<128xf32>
    %17 = vector.shape_cast %16 : vector<128xf32> to vector<1x128xf32>
    %18 = arith.addf %15, %17 : vector<1x128xf32>
    %c0_6 = arith.constant 0 : index
    %c0_7 = arith.constant 0 : index
    %19 = vector.load %arg8[%c0_6, %c0_7] : memref<1x128xf32, #tpu.memory_space<vmem>>, vector<1x128xf32>
    tpu.vector_store %arg8[%c0_6, %c0_7], %18 {strides = array<i32>} : memref<1x128xf32, #tpu.memory_space<vmem>>, vector<1x128xf32>,
    %c0_i32_8 = arith.constant 0 : i32
    %20 = arith.cmpi eq, %arg0, %c0_i32_8 : i32
    %21 = arith.extui %20 : i1 to i32
    %c0_i32_9 = arith.constant 0 : i32
    %22 = arith.cmpi ne, %21, %c0_i32_9 : i32
    scf.if %22 {
      %c0_10 = arith.constant 0 : index
      %23 = memref.load %arg1[%c0_10] : memref<1xi32, #tpu.memory_space<smem>>
      %24 = arith.sitofp %23 : i32 to f32
      %cst_11 = arith.constant 1.000000e+00 : f32
      %25 = arith.divf %cst_11, %24 : f32
      %c0_12 = arith.constant 0 : index
      %c0_13 = arith.constant 0 : index
      %26 = vector.load %arg8[%c0_12, %c0_13] : memref<1x128xf32, #tpu.memory_space<vmem>>, vector<1x128xf32>
      %27 = vector.broadcast %25 : f32 to vector<1x128xf32>
      %28 = arith.mulf %26, %27 : vector<1x128xf32>
      %c0_14 = arith.constant 0 : index
      %c0_15 = arith.constant 0 : index
      %29 = vector.load %arg3[%c0_14, %c0_15] : memref<128x128xf32, #tpu.memory_space<vmem>>, vector<128x128xf32>
      %cst_16 = arith.constant dense<0.000000e+00> : vector<1x128xf32>
      %30 = tpu.matmul %28, %29, %cst_16 {dimension_numbers = #tpu.dot_dimension_numbers<[1], [0], [0], [1], [0, 0, 1, 1], [], []>} : vector<1x128xf32>, vector<128x128xf32>, vector<1x128xf32> -> vector<1x128xf32>
      %c0_17 = arith.constant 0 : index
      %c0_18 = arith.constant 0 : index
      %31 = vector.load %arg4[%c0_17, %c0_18] : memref<1x128xf32, #tpu.memory_space<vmem>>, vector<1x128xf32>
      %32 = arith.addf %30, %31 : vector<1x128xf32>
      %cst_19 = arith.constant 0.000000e+00 : f32
      %33 = vector.broadcast %cst_19 : f32 to vector<1x128xf32>
      %34 = arith.cmpf ogt, %32, %33 : vector<1x128xf32>
      %cst_20 = arith.constant 0.00999999977 : f32
      %35 = vector.broadcast %cst_20 : f32 to vector<1x128xf32>
      %36 = arith.mulf %35, %32 : vector<1x128xf32>
      %37 = arith.select %34, %32, %36 : vector<1x128xi1>, vector<1x128xf32>
      %c0_21 = arith.constant 0 : index
      %c0_22 = arith.constant 0 : index
      %38 = vector.load %arg5[%c0_21, %c0_22] : memref<128x128xf32, #tpu.memory_space<vmem>>, vector<128x128xf32>
      %cst_23 = arith.constant dense<0.000000e+00> : vector<1x128xf32>
      %39 = tpu.matmul %37, %38, %cst_23 {dimension_numbers = #tpu.dot_dimension_numbers<[1], [0], [0], [1], [0, 0, 1, 1], [], []>} : vector<1x128xf32>, vector<128x128xf32>, vector<1x128xf32> -> vector<1x128xf32>
      %c0_24 = arith.constant 0 : index
      %c0_25 = arith.constant 0 : index
      %40 = vector.load %arg6[%c0_24, %c0_25] : memref<1x128xf32, #tpu.memory_space<vmem>>, vector<1x128xf32>
      %41 = arith.addf %39, %40 : vector<1x128xf32>
      %42 = tpu.iota {dimensions = array<i32: 1>} : vector<1x128xi32>
      %c3_i32 = arith.constant 3 : i32
      %43 = vector.broadcast %c3_i32 : i32 to vector<1x128xi32>
      %44 = arith.cmpi slt, %42, %43 : vector<1x128xi32>
      %cst_26 = arith.constant -1.000000e+30 : f32
      %45 = vector.broadcast %cst_26 : f32 to vector<1x128xf32>
      %46 = arith.select %44, %41, %45 : vector<1x128xi1>, vector<1x128xf32>
      %cst_27 = arith.constant dense<0xFF800000> : vector<1xf32>
      %47 = vector.multi_reduction <maximumf>, %46, %cst_27 [1] : vector<1x128xf32> to vector<1xf32>
      %48 = vector.shape_cast %47 : vector<1xf32> to vector<1x1xf32>
      %49 = vector.broadcast %48 : vector<1x1xf32> to vector<1x128xf32>
      %50 = arith.subf %46, %49 : vector<1x128xf32>
      %51 = math.exp %50 : vector<1x128xf32>
      %cst_28 = arith.constant dense<0.000000e+00> : vector<1xf32>
      %52 = vector.multi_reduction <add>, %51, %cst_28 [1] : vector<1x128xf32> to vector<1xf32>
      %53 = vector.shape_cast %52 : vector<1xf32> to vector<1x1xf32>
      %54 = math.log %53 : vector<1x1xf32>
      %55 = arith.addf %54, %48 : vector<1x1xf32>
      %56 = vector.broadcast %55 : vector<1x1xf32> to vector<1x128xf32>
      %57 = arith.subf %46, %56 : vector<1x128xf32>
      %c0_29 = arith.constant 0 : index
      %c0_30 = arith.constant 0 : index
      %58 = vector.load %arg7[%c0_29, %c0_30] : memref<1x128xf32, #tpu.memory_space<vmem>>, vector<1x128xf32>
      tpu.vector_store %arg7[%c0_29, %c0_30], %57 {strides = array<i32>} : memref<1x128xf32, #tpu.memory_space<vmem>>, vector<1x128xf32>,
    } else {
    }
    return
  }
  func.func @transform_0(%arg0: i32, %arg1: memref<1xi32, #tpu.memory_space<smem>>) -> (i32, i32) {
    %c0_i32 = arith.constant 0 : i32
    %c0_i32_0 = arith.constant 0 : i32
    return %arg0, %c0_i32 : i32, i32
  }
  func.func @transform_1(%arg0: i32, %arg1: memref<1xi32, #tpu.memory_space<smem>>) -> (i32, i32) {
    %c0_i32 = arith.constant 0 : i32
    %c0_i32_0 = arith.constant 0 : i32
    %c0_i32_1 = arith.constant 0 : i32
    return %c0_i32, %c0_i32_0 : i32, i32
  }
  func.func @transform_2(%arg0: i32, %arg1: memref<1xi32, #tpu.memory_space<smem>>) -> (i32, i32) {
    %c0_i32 = arith.constant 0 : i32
    %c0_i32_0 = arith.constant 0 : i32
    %c0_i32_1 = arith.constant 0 : i32
    return %c0_i32, %c0_i32_0 : i32, i32
  }
  func.func @transform_3(%arg0: i32, %arg1: memref<1xi32, #tpu.memory_space<smem>>) -> (i32, i32) {
    %c0_i32 = arith.constant 0 : i32
    %c0_i32_0 = arith.constant 0 : i32
    %c0_i32_1 = arith.constant 0 : i32
    return %c0_i32, %c0_i32_0 : i32, i32
  }
  func.func @transform_4(%arg0: i32, %arg1: memref<1xi32, #tpu.memory_space<smem>>) -> (i32, i32) {
    %c0_i32 = arith.constant 0 : i32
    %c0_i32_0 = arith.constant 0 : i32
    %c0_i32_1 = arith.constant 0 : i32
    return %c0_i32, %c0_i32_0 : i32, i32
  }
  func.func @transform_5(%arg0: i32, %arg1: memref<1xi32, #tpu.memory_space<smem>>) -> (i32, i32) {
    %c0_i32 = arith.constant 0 : i32
    %c0_i32_0 = arith.constant 0 : i32
    %c0_i32_1 = arith.constant 0 : i32
    return %c0_i32, %c0_i32_0 : i32, i32
  }
}

</mosaic_0001>

<bundles_post_ra>
// kernel: gnn_forward.5
= control target key start
LH: loop header
LB: loop body
LE: loop exit
PB: predicated region body
PF: predicated region fallthrough
CT: control target
= control target key end

     0   :  { %s350_s1 = inlined_call_operand.vmem [shape: f32[128,128], index: 1, kind: input, shape index: {}]   ;;  %s351_s0 = inlined_call_operand.vmem [shape: f32[128,128], index: 0, kind: input, shape index: {}]   ;;  %s352_s2 = inlined_call_operand.vmem [shape: bf16[128,128], index: 2, kind: output, shape index: {}]  }
   0x1   :  { %v49_v0 = vld [vmem:[%s350_s1 + $0x70] sm:$0xff]  ;;  %v50_v1 = vld [vmem:[%s350_s1 + $0x78] sm:$0xff]  ;;  %v47_v2 = vld [vmem:[%s350_s1 + $0x60] sm:$0xff] }
   0x2   :  { %v58_v3 = vpack.c.bf16 %v50_v1, %v49_v0  ;;  %v48_v4 = vld [vmem:[%s350_s1 + $0x68] sm:$0xff]  ;;  %v45_v6 = vld [vmem:[%s350_s1 + $0x50] sm:$0xff]  ;;  %v46_v7 = vld [vmem:[%s350_s1 + $0x58] sm:$0xff] }
   0x3   :  { %v57_v5 = vpack.c.bf16 %v48_v4, %v47_v2  ;;  %v56_v8 = vpack.c.bf16 %v46_v7, %v45_v6  ;;  %v43_v9 = vld [vmem:[%s350_s1 + $0x40] sm:$0xff]  ;;  %v44_v10 = vld [vmem:[%s350_s1 + $0x48] sm:$0xff]  ;;  %v41_v12 = vld [vmem:[%s350_s1 + $0x30] sm:$0xff] }
   0x4   :  { %59 = vmatpush.bf16.msra.mxu0 %v58_v3  ;;  %191 = vmatpush.bf16.msra.mxu1 %v58_v3  ;;  %v55_v11 = vpack.c.bf16 %v44_v10, %v43_v9  ;;  %v42_v13 = vld [vmem:[%s350_s1 + $0x38] sm:$0xff]  ;;  %v39_v15 = vld [vmem:[%s350_s1 + $0x20] sm:$0xff]  ;;  %v40_v16 = vld [vmem:[%s350_s1 + $0x28] sm:$0xff] }
   0x5   :  { %192 = vmatpush.bf16.msra.mxu2 %v58_v3  ;;  %193 = vmatpush.bf16.msra.mxu3 %v58_v3  ;;  %v54_v14 = vpack.c.bf16 %v42_v13, %v41_v12  ;;  %v53_v17 = vpack.c.bf16 %v40_v16, %v39_v15  ;;  %v37_v18 = vld [vmem:[%s350_s1 + $0x10] sm:$0xff]  ;;  %v38_v19 = vld [vmem:[%s350_s1 + $0x18] sm:$0xff]  ;;  %v35_v21 = vld [vmem:[%s350_s1] sm:$0xff] }
   0x6   :  { %v52_v20 = vpack.c.bf16 %v38_v19, %v37_v18  ;;  %v36_v22 = vld [vmem:[%s350_s1 + $0x8] sm:$0xff]  ;;  %v11_v23 = vld [vmem:[%s351_s0] sm:$0xff]  ;;  %v13_v36 = vld [vmem:[%s351_s0 + $0x10] sm:$0xff] }
   0x7   :  { %v12_v24 = vld [vmem:[%s351_s0 + $0x8] sm:$0xff]  ;;  %v51_v25 = vpack.c.bf16 %v36_v22, %v35_v21  ;;  %v15_v26 = vld [vmem:[%s351_s0 + $0x20] sm:$0xff]  ;;  %v14_v37 = vld [vmem:[%s351_s0 + $0x18] sm:$0xff] }
   0x8   :  { %60 = vmatpush.bf16.msra.mxu0 %v57_v5  ;;  %194 = vmatpush.bf16.msra.mxu1 %v57_v5  ;;  %v16_v27 = vld [vmem:[%s351_s0 + $0x28] sm:$0xff]  ;;  %v19_v28 = vld [vmem:[%s351_s0 + $0x40] sm:$0xff]  ;;  %v27_v32 = vpack.c.bf16 %v12_v24, %v11_v23  ;;  %v17_v38 = vld [vmem:[%s351_s0 + $0x30] sm:$0xff]  ;;  %v28_v44 = vpack.c.bf16 %v14_v37, %v13_v36 }
   0x9   :  { %195 = vmatpush.bf16.msra.mxu2 %v57_v5  ;;  %196 = vmatpush.bf16.msra.mxu3 %v57_v5  ;;  %v20_v29 = vld [vmem:[%s351_s0 + $0x48] sm:$0xff]  ;;  %v23_v30 = vld [vmem:[%s351_s0 + $0x60] sm:$0xff]  ;;  %v29_v33 = vpack.c.bf16 %v16_v27, %v15_v26  ;;  %v18_v39 = vld [vmem:[%s351_s0 + $0x38] sm:$0xff] }
   0xa   :  { %v24_v31 = vld [vmem:[%s351_s0 + $0x68] sm:$0xff]  ;;  %v31_v34 = vpack.c.bf16 %v20_v29, %v19_v28  ;;  %v21_v40 = vld [vmem:[%s351_s0 + $0x50] sm:$0xff]  ;;  %v22_v41 = vld [vmem:[%s351_s0 + $0x58] sm:$0xff]  ;;  %v30_v45 = vpack.c.bf16 %v18_v39, %v17_v38 }
   0xb   :  { %v33_v35 = vpack.c.bf16 %v24_v31, %v23_v30  ;;  %v25_v42 = vld [vmem:[%s351_s0 + $0x70] sm:$0xff]  ;;  %v26_v43 = vld [vmem:[%s351_s0 + $0x78] sm:$0xff]  ;;  %v32_v46 = vpack.c.bf16 %v22_v41, %v21_v40 }
   0xc   :  { %61 = vmatpush.bf16.msra.mxu0 %v56_v8  ;;  %197 = vmatpush.bf16.msra.mxu1 %v56_v8  ;;  %v34_v47 = vpack.c.bf16 %v26_v43, %v25_v42 }
   0xd   :  { %198 = vmatpush.bf16.msra.mxu2 %v56_v8  ;;  %199 = vmatpush.bf16.msra.mxu3 %v56_v8 }
  0x10   :  { %62 = vmatpush.bf16.msra.mxu0 %v55_v11  ;;  %200 = vmatpush.bf16.msra.mxu1 %v55_v11 }
  0x11   :  { %201 = vmatpush.bf16.msra.mxu2 %v55_v11  ;;  %202 = vmatpush.bf16.msra.mxu3 %v55_v11 }
  0x14   :  { %63 = vmatpush.bf16.msra.mxu0 %v54_v14  ;;  %203 = vmatpush.bf16.msra.mxu1 %v54_v14 }
  0x15   :  { %204 = vmatpush.bf16.msra.mxu2 %v54_v14  ;;  %205 = vmatpush.bf16.msra.mxu3 %v54_v14 }
  0x18   :  { %64 = vmatpush.bf16.msra.mxu0 %v53_v17  ;;  %206 = vmatpush.bf16.msra.mxu1 %v53_v17 }
  0x19   :  { %207 = vmatpush.bf16.msra.mxu2 %v53_v17  ;;  %208 = vmatpush.bf16.msra.mxu3 %v53_v17 }
  0x1c   :  { %65 = vmatpush.bf16.msra.mxu0 %v52_v20  ;;  %209 = vmatpush.bf16.msra.mxu1 %v52_v20 }
  0x1d   :  { %210 = vmatpush.bf16.msra.mxu2 %v52_v20  ;;  %211 = vmatpush.bf16.msra.mxu3 %v52_v20 }
  0x20   :  { %66 = vmatpush.bf16.msra.mxu0 %v51_v25  ;;  %212 = vmatpush.bf16.msra.mxu1 %v51_v25 }
  0x21   :  { %213 = vmatpush.bf16.msra.mxu2 %v51_v25  ;;  %214 = vmatpush.bf16.msra.mxu3 %v51_v25 }
  0x23   :  { %67 = vmatmul.bf16.vlgmr.msra.gmra.mxu0 %v27_v32  ;;  %77 = vmatmul.bf16.vlgmr.msra.gmra.mxu1 %v29_v33 }
  0x24   :  { %87 = vmatmul.bf16.vlgmr.msra.gmra.mxu2 %v31_v34  ;;  %97 = vmatmul.bf16.vlgmr.msra.gmra.mxu3 %v33_v35 }
  0x33   :  { %72 = vmatmul.bf16.gmra.mxu0 %v28_v44  ;;  %82 = vmatmul.bf16.gmra.mxu1 %v30_v45 }
  0x34   :  { %92 = vmatmul.bf16.gmra.mxu2 %v32_v46  ;;  %102 = vmatmul.bf16.gmra.mxu3 %v34_v47 }
  0xa0   :  { %v68_v48 = vpop.f32.mrf.mxu0  ;;  %v78_v49 = vpop.f32.mrf.mxu1 }
  0xa7   :  { %v88_v50 = vpop.f32.mrf.mxu2  ;;  %v98_v51 = vpop.f32.mrf.mxu3 }
  0xa8   :  { %v70_v52 = vpop.f32.mrf.mxu0  ;;  %v80_v53 = vpop.f32.mrf.mxu1 }
  0xa9   :  { %v147_v54 = vpack.c.bf16 %v70_v52, %v68_v48  ;;  %v157_v55 = vpack.c.bf16 %v80_v53, %v78_v49 }
  0xab   :  { %148 = vst [vmem:[%s352_s2] sm:$0xff] %v147_v54  }
  0xac   :  { %185 = vst [vmem:[%s352_s2 + $0x10] sm:$0xff] %v157_v55  }
  0xaf   :  { %v90_v56 = vpop.f32.mrf.mxu2  ;;  %v100_v57 = vpop.f32.mrf.mxu3 }
  0xb0   :  { %v167_v58 = vpack.c.bf16 %v90_v56, %v88_v50  ;;  %v177_v59 = vpack.c.bf16 %v100_v57, %v98_v51  ;;  %v73_v60 = vpop.f32.mrf.mxu0  ;;  %v83_v61 = vpop.f32.mrf.mxu1 }
  0xb2   :  { %187 = vst [vmem:[%s352_s2 + $0x20] sm:$0xff] %v167_v58  }
  0xb3   :  { %189 = vst [vmem:[%s352_s2 + $0x30] sm:$0xff] %v177_v59  }
  0xb7   :  { %v93_v62 = vpop.f32.mrf.mxu2  ;;  %v103_v63 = vpop.f32.mrf.mxu3 }
  0xb8   :  { %v75_v0 = vpop.f32.mrf.mxu0  ;;  %v85_v1 = vpop.f32.mrf.mxu1 }
  0xb9   :  { %v152_v2 = vpack.c.bf16 %v75_v0, %v73_v60  ;;  %v162_v3 = vpack.c.bf16 %v85_v1, %v83_v61 }
  0xbb   :  { %184 = vst [vmem:[%s352_s2 + $0x8] sm:$0xff] %v152_v2  }
  0xbc   :  { %186 = vst [vmem:[%s352_s2 + $0x18] sm:$0xff] %v162_v3  }
  0xbf   :  { %v95_v4 = vpop.f32.mrf.mxu2  ;;  %v105_v5 = vpop.f32.mrf.mxu3 }
  0xc0   :  { %v172_v6 = vpack.c.bf16 %v95_v4, %v93_v62  ;;  %v182_v7 = vpack.c.bf16 %v105_v5, %v103_v63 }
  0xc2   :  { %188 = vst [vmem:[%s352_s2 + $0x28] sm:$0xff] %v172_v6  }
  0xc3   :  { %190 = vst [vmem:[%s352_s2 + $0x38] sm:$0xff] %v182_v7  }

// kernel: gnn_forward.6
= control target key start
LH: loop header
LB: loop body
LE: loop exit
PB: predicated region body
PF: predicated region fallthrough
CT: control target
= control target key end

     0   :  { %s1181_s4 = inlined_call_operand.vmem [shape: f32[128,128], index: 4, kind: input, shape index: {}]   ;;  %s1182_s1 = inlined_call_operand.vmem [shape: bf16[128,128], index: 1, kind: input, shape index: {}]   ;;  %s1183_s5 = inlined_call_operand.vmem [shape: f32[128,128], index: 5, kind: input, shape index: {}]   ;;  %s1184_s2 = inlined_call_operand.vmem [shape: f32[128,128], index: 2, kind: input, shape index: {}]   ;;  %s1185_s0 = inlined_call_operand.vmem [shape: bf16[128,128], index: 0, kind: input, shape index: {}]   ;;  %s1186_s3 = inlined_call_operand.vmem [shape: f32[128,128], index: 3, kind: input, shape index: {}]   ;;  %s1187_s6 = inlined_call_operand.vmem [shape: f32[1,128], index: 6, kind: input, shape index: {}]   ;;  %s1188_s7 = inlined_call_operand.vmem [shape: f32[128,128], index: 7, kind: output, shape index: {}]  }
   0x1   :  { %v752_v0 = vld [vmem:[%s1181_s4 + $0x78] sm:$0xff]  ;;  %v760_v2 = vld [vmem:[%s1181_s4 + $0x70] sm:$0xff]  ;;  %v771_v4 = vld [vmem:[%s1181_s4 + $0x68] sm:$0xff] }
   0x2   :  { %v667_v1 = vld [vmem:[%s1182_s1 + $0x38] sm:$0xff]  ;;  %403 = vmatpush.msra.mxu2 %v752_v0  ;;  %v666_v5 = vld [vmem:[%s1182_s1 + $0x30] sm:$0xff]  ;;  %v786_v7 = vld [vmem:[%s1181_s4 + $0x60] sm:$0xff] }
   0x3   :  { %v766_v3 = vld [vmem:[%s1183_s5 + $0x78] sm:$0xff]  ;;  %668 = vmatpush.bf16.msra.mxu3 %v667_v1  ;;  %190 = vmatpush.bf16.msra.mxu0 %v667_v1  ;;  %v779_v6 = vld [vmem:[%s1183_s5 + $0x70] sm:$0xff]  ;;  %v791_v8 = vld [vmem:[%s1183_s5 + $0x68] sm:$0xff] }
   0x4   :  { %404 = vmatpush.msra.mxu2 %v760_v2  ;;  %338 = vmatpush.msra.mxu1 %v766_v3  ;;  %v798_v9 = vld [vmem:[%s1181_s4 + $0x58] sm:$0xff]  ;;  %v665_v10 = vld [vmem:[%s1182_s1 + $0x28] sm:$0xff]  ;;  %v806_v11 = vld [vmem:[%s1183_s5 + $0x60] sm:$0xff] }
   0x5   :  { %v813_v12 = vld [vmem:[%s1181_s4 + $0x50] sm:$0xff]  ;;  %v818_v13 = vld [vmem:[%s1183_s5 + $0x58] sm:$0xff]  ;;  %v825_v14 = vld [vmem:[%s1181_s4 + $0x48] sm:$0xff] }
   0x6   :  { %405 = vmatpush.msra.mxu2 %v771_v4  ;;  %339 = vmatpush.msra.mxu1 %v779_v6  ;;  %v664_v15 = vld [vmem:[%s1182_s1 + $0x20] sm:$0xff]  ;;  %v833_v16 = vld [vmem:[%s1183_s5 + $0x50] sm:$0xff]  ;;  %v845_v18 = vld [vmem:[%s1183_s5 + $0x48] sm:$0xff] }
   0x7   :  { %669 = vmatpush.bf16.msra.mxu3 %v666_v5  ;;  %191 = vmatpush.bf16.msra.mxu0 %v666_v5  ;;  %v840_v17 = vld [vmem:[%s1181_s4 + $0x40] sm:$0xff]  ;;  %v852_v19 = vld [vmem:[%s1181_s4 + $0x38] sm:$0xff]  ;;  %v867_v22 = vld [vmem:[%s1181_s4 + $0x30] sm:$0xff] }
   0x8   :  { %406 = vmatpush.msra.mxu2 %v786_v7  ;;  %340 = vmatpush.msra.mxu1 %v791_v8  ;;  %v663_v20 = vld [vmem:[%s1182_s1 + $0x18] sm:$0xff]  ;;  %v860_v21 = vld [vmem:[%s1183_s5 + $0x40] sm:$0xff]  ;;  %v879_v24 = vld [vmem:[%s1181_s4 + $0x28] sm:$0xff] }
   0x9   :  { %v872_v23 = vld [vmem:[%s1183_s5 + $0x38] sm:$0xff]  ;;  %v662_v25 = vld [vmem:[%s1182_s1 + $0x10] sm:$0xff]  ;;  %v894_v27 = vld [vmem:[%s1181_s4 + $0x20] sm:$0xff] }
   0xa   :  { %407 = vmatpush.msra.mxu2 %v798_v9  ;;  %341 = vmatpush.msra.mxu1 %v806_v11  ;;  %v887_v26 = vld [vmem:[%s1183_s5 + $0x30] sm:$0xff]  ;;  %v899_v28 = vld [vmem:[%s1183_s5 + $0x28] sm:$0xff]  ;;  %v906_v29 = vld [vmem:[%s1181_s4 + $0x18] sm:$0xff] }
   0xb   :  { %670 = vmatpush.bf16.msra.mxu3 %v665_v10  ;;  %192 = vmatpush.bf16.msra.mxu0 %v665_v10  ;;  %v661_v30 = vld [vmem:[%s1182_s1 + $0x8] sm:$0xff]  ;;  %v326_v31 = vld [vmem:[%s1183_s5 + $0x20] sm:$0xff]  ;;  %v919_v32 = vld [vmem:[%s1181_s4 + $0x10] sm:$0xff] }
   0xc   :  { %408 = vmatpush.msra.mxu2 %v813_v12  ;;  %342 = vmatpush.msra.mxu1 %v818_v13  ;;  %v325_v33 = vld [vmem:[%s1183_s5 + $0x18] sm:$0xff]  ;;  %v928_v34 = vld [vmem:[%s1181_s4 + $0x8] sm:$0xff]  ;;  %v660_v35 = vld [vmem:[%s1182_s1] sm:$0xff] }
   0xd   :  { %v324_v36 = vld [vmem:[%s1183_s5 + $0x10] sm:$0xff]  ;;  %v940_v37 = vld [vmem:[%s1181_s4] sm:$0xff]  ;;  %v323_v40 = vld [vmem:[%s1183_s5 + $0x8] sm:$0xff] }
   0xe   :  { %409 = vmatpush.msra.mxu2 %v825_v14  ;;  %343 = vmatpush.msra.mxu1 %v833_v16  ;;  %v274_v38 = vld [vmem:[%s1184_s2] sm:$0xff]  ;;  %v658_v39 = vld [vmem:[%s1185_s0 + $0x30] sm:$0xff]  ;;  %v275_v44 = vld [vmem:[%s1184_s2 + $0x8] sm:$0xff] }
   0xf   :  { %671 = vmatpush.bf16.msra.mxu3 %v664_v15  ;;  %193 = vmatpush.bf16.msra.mxu0 %v664_v15  ;;  %v652_v41 = vld [vmem:[%s1185_s0] sm:$0xff]  ;;  %v307_v45 = vld [vmem:[%s1186_s3 + $0x8] sm:$0xff]  ;;  %v276_v46 = vld [vmem:[%s1184_s2 + $0x10] sm:$0xff] }
  0x10   :  { %410 = vmatpush.msra.mxu2 %v840_v17  ;;  %344 = vmatpush.msra.mxu1 %v845_v18  ;;  %v322_v42 = vld [vmem:[%s1183_s5] sm:$0xff]  ;;  %v659_v47 = vld [vmem:[%s1185_s0 + $0x38] sm:$0xff]  ;;  %v653_v48 = vld [vmem:[%s1185_s0 + $0x8] sm:$0xff] }
  0x11   :  { %v306_v43 = vld [vmem:[%s1186_s3] sm:$0xff]  ;;  %v308_v49 = vld [vmem:[%s1186_s3 + $0x10] sm:$0xff]  ;;  %v277_v50 = vld [vmem:[%s1184_s2 + $0x18] sm:$0xff] }
  0x12   :  { %411 = vmatpush.msra.mxu2 %v852_v19  ;;  %345 = vmatpush.msra.mxu1 %v860_v21  ;;  %v309_v51 = vld [vmem:[%s1186_s3 + $0x18] sm:$0xff]  ;;  %v278_v52 = vld [vmem:[%s1184_s2 + $0x20] sm:$0xff]  ;;  %v654_v53 = vld [vmem:[%s1185_s0 + $0x10] sm:$0xff] }
  0x13   :  { %672 = vmatpush.bf16.msra.mxu3 %v663_v20  ;;  %194 = vmatpush.bf16.msra.mxu0 %v663_v20  ;;  %v318_v54 = vld [vmem:[%s1186_s3 + $0x60] sm:$0xff]  ;;  %v279_v56 = vld [vmem:[%s1184_s2 + $0x28] sm:$0xff]  ;;  %v280_v59 = vld [vmem:[%s1184_s2 + $0x30] sm:$0xff] }
  0x14   :  { %412 = vmatpush.msra.mxu2 %v867_v22  ;;  %346 = vmatpush.msra.mxu1 %v872_v23  ;;  %v310_v55 = vld [vmem:[%s1186_s3 + $0x20] sm:$0xff]  ;;  %v319_v57 = vld [vmem:[%s1186_s3 + $0x68] sm:$0xff]  ;;  %v655_v60 = vld [vmem:[%s1185_s0 + $0x18] sm:$0xff] }
  0x15   :  { %v311_v58 = vld [vmem:[%s1186_s3 + $0x28] sm:$0xff]  ;;  %v320_v61 = vld [vmem:[%s1186_s3 + $0x70] sm:$0xff]  ;;  %v281_v63 = vld [vmem:[%s1184_s2 + $0x38] sm:$0xff] }
  0x16   :  { %413 = vmatpush.msra.mxu2 %v879_v24  ;;  %347 = vmatpush.msra.mxu1 %v887_v26  ;;  %v312_v62 = vld [vmem:[%s1186_s3 + $0x30] sm:$0xff]  ;;  %v313_v1 = vld [vmem:[%s1186_s3 + $0x38] sm:$0xff]  ;;  %v314_v5 = vld [vmem:[%s1186_s3 + $0x40] sm:$0xff] }
  0x17   :  { %673 = vmatpush.bf16.msra.mxu3 %v662_v25  ;;  %195 = vmatpush.bf16.msra.mxu0 %v662_v25  ;;  %v657_v10 = vld [vmem:[%s1185_s0 + $0x28] sm:$0xff]  ;;  %v317_v15 = vld [vmem:[%s1186_s3 + $0x58] sm:$0xff] }
  0x18   :  { %414 = vmatpush.msra.mxu2 %v894_v27  ;;  %348 = vmatpush.msra.mxu1 %v899_v28 }
  0x1a   :  { %415 = vmatpush.msra.mxu2 %v906_v29  ;;  %349 = vmatpush.msra.mxu1 %v326_v31 }
  0x1b   :  { %674 = vmatpush.bf16.msra.mxu3 %v661_v30  ;;  %196 = vmatpush.bf16.msra.mxu0 %v661_v30 }
  0x1c   :  { %416 = vmatpush.msra.mxu2 %v919_v32  ;;  %350 = vmatpush.msra.mxu1 %v325_v33 }
  0x1e   :  { %417 = vmatpush.msra.mxu2 %v928_v34  ;;  %351 = vmatpush.msra.mxu1 %v324_v36 }
  0x1f   :  { %675 = vmatpush.bf16.msra.mxu3 %v660_v35  ;;  %197 = vmatpush.bf16.msra.mxu0 %v660_v35 }
  0x20   :  { %418 = vmatpush.msra.mxu2 %v940_v37  ;;  %352 = vmatpush.msra.mxu1 %v323_v40 }
  0x21   :  { %419 = vmatmul.f32.vlgmr.msra.gmra.mxu2 %v274_v38 }
  0x22   :  { %228 = vmatmul.bf16.vlgmr.msra.gmra.mxu3 %v658_v39  ;;  %198 = vmatmul.bf16.vlgmr.msra.gmra.mxu0 %v652_v41 }
  0x23   :  { %676 = vmatpush.msrb.mxu3 %v766_v3  ;;  %353 = vmatpush.msra.mxu1 %v322_v42  ;;  %v656_v3 = vld [vmem:[%s1185_s0 + $0x20] sm:$0xff] }
  0x24   :  { %354 = vmatmul.f32.vlgmr.msra.gmra.mxu1 %v306_v43 }
  0x25   :  { %677 = vmatpush.msrb.mxu3 %v779_v6  ;;  %v283_v6 = vld [vmem:[%s1184_s2 + $0x48] sm:$0xff] }
  0x27   :  { %678 = vmatpush.msrb.mxu3 %v791_v8  ;;  %v315_v8 = vld [vmem:[%s1186_s3 + $0x48] sm:$0xff] }
  0x29   :  { %679 = vmatpush.msrb.mxu3 %v806_v11  ;;  %422 = vmatmul.f32.gmra.mxu2 %v275_v44  ;;  %v288_v11 = vld [vmem:[%s1184_s2 + $0x70] sm:$0xff] }
  0x2b   :  { %680 = vmatpush.msrb.mxu3 %v818_v13  ;;  %v285_v13 = vld [vmem:[%s1184_s2 + $0x58] sm:$0xff] }
  0x2c   :  { %357 = vmatmul.f32.gmra.mxu1 %v307_v45 }
  0x2d   :  { %681 = vmatpush.msrb.mxu3 %v833_v16 }
  0x2f   :  { %682 = vmatpush.msrb.mxu3 %v845_v18  ;;  %v1100_v18 = vld [vmem:[%s1187_s6] ss:$0 sm:$0xff] }
  0x31   :  { %683 = vmatpush.msrb.mxu3 %v860_v21  ;;  %425 = vmatmul.f32.gmra.mxu2 %v276_v46 }
  0x32   :  { %233 = vmatmul.bf16.gmra.mxu3 %v659_v47  ;;  %203 = vmatmul.bf16.gmra.mxu0 %v653_v48 }
  0x33   :  { %684 = vmatpush.msrb.mxu3 %v872_v23 }
  0x34   :  { %360 = vmatmul.f32.gmra.mxu1 %v308_v49 }
  0x35   :  { %685 = vmatpush.msrb.mxu3 %v887_v26 }
  0x37   :  { %686 = vmatpush.msrb.mxu3 %v899_v28 }
  0x39   :  { %687 = vmatpush.msrb.mxu3 %v326_v31  ;;  %428 = vmatmul.f32.gmra.mxu2 %v277_v50 }
  0x3b   :  { %688 = vmatpush.msrb.mxu3 %v325_v33 }
  0x3c   :  { %363 = vmatmul.f32.gmra.mxu1 %v309_v51 }
  0x3d   :  { %689 = vmatpush.msrb.mxu3 %v324_v36 }
  0x3f   :  { %690 = vmatpush.msrb.mxu3 %v323_v40 }
  0x41   :  { %691 = vmatpush.msrb.mxu3 %v322_v42  ;;  %431 = vmatmul.f32.gmra.mxu2 %v278_v52 }
  0x42   :  { %390 = vmatmul.f32.vlgmr.msrb.gmra.mxu3 %v318_v54  ;;  %208 = vmatmul.bf16.gmra.mxu0 %v654_v53 }
  0x43   :  { %692 = vmatpush.msra.mxu3 %v752_v0  ;;  %v321_v0 = vld [vmem:[%s1186_s3 + $0x78] sm:$0xff] }
  0x44   :  { %366 = vmatmul.f32.gmra.mxu1 %v310_v55 }
  0x45   :  { %693 = vmatpush.msra.mxu3 %v760_v2  ;;  %v282_v2 = vld [vmem:[%s1184_s2 + $0x40] sm:$0xff] }
  0x47   :  { %694 = vmatpush.msra.mxu3 %v771_v4  ;;  %v286_v4 = vld [vmem:[%s1184_s2 + $0x60] sm:$0xff] }
  0x49   :  { %695 = vmatpush.msra.mxu3 %v786_v7  ;;  %434 = vmatmul.f32.gmra.mxu2 %v279_v56  ;;  %v287_v7 = vld [vmem:[%s1184_s2 + $0x68] sm:$0xff] }
  0x4a   :  { %393 = vmatmul.f32.gmra.mxu3 %v319_v57 }
  0x4b   :  { %696 = vmatpush.msra.mxu3 %v798_v9  ;;  %v284_v9 = vld [vmem:[%s1184_s2 + $0x50] sm:$0xff] }
  0x4c   :  { %369 = vmatmul.f32.gmra.mxu1 %v311_v58 }
  0x4d   :  { %697 = vmatpush.msra.mxu3 %v813_v12  ;;  %v316_v12 = vld [vmem:[%s1186_s3 + $0x50] sm:$0xff] }
  0x4f   :  { %698 = vmatpush.msra.mxu3 %v825_v14  ;;  %v289_v14 = vld [vmem:[%s1184_s2 + $0x78] sm:$0xff] }
  0x51   :  { %699 = vmatpush.msra.mxu3 %v840_v17  ;;  %437 = vmatmul.f32.gmra.mxu2 %v280_v59 }
  0x52   :  { %396 = vmatmul.f32.gmra.mxu3 %v320_v61  ;;  %213 = vmatmul.bf16.gmra.mxu0 %v655_v60 }
  0x53   :  { %700 = vmatpush.msra.mxu3 %v852_v19 }
  0x54   :  { %372 = vmatmul.f32.gmra.mxu1 %v312_v62 }
  0x55   :  { %701 = vmatpush.msra.mxu3 %v867_v22 }
  0x57   :  { %702 = vmatpush.msra.mxu3 %v879_v24 }
  0x59   :  { %703 = vmatpush.msra.mxu3 %v894_v27  ;;  %440 = vmatmul.f32.gmra.mxu2 %v281_v63 }
  0x5a   :  { %399 = vmatmul.f32.gmra.mxu3 %v321_v0 }
  0x5b   :  { %704 = vmatpush.msra.mxu3 %v906_v29 }
  0x5c   :  { %375 = vmatmul.f32.gmra.mxu1 %v313_v1 }
  0x5d   :  { %705 = vmatpush.msra.mxu3 %v919_v32 }
  0x5f   :  { %706 = vmatpush.msra.mxu3 %v928_v34 }
  0x61   :  { %707 = vmatpush.msra.mxu3 %v940_v37  ;;  %443 = vmatmul.f32.gmra.mxu2 %v282_v2 }
  0x62   :  { %455 = vmatmul.f32.vlgmr.msra.gmra.mxu3 %v286_v4  ;;  %218 = vmatmul.bf16.gmra.mxu0 %v656_v3 }
  0x64   :  { %378 = vmatmul.f32.gmra.mxu1 %v314_v5 }
  0x69   :  { %446 = vmatmul.f32.gmra.mxu2 %v283_v6 }
  0x6a   :  { %458 = vmatmul.f32.gmra.mxu3 %v287_v7 }
  0x6c   :  { %381 = vmatmul.f32.gmra.mxu1 %v315_v8 }
  0x71   :  { %449 = vmatmul.f32.gmra.mxu2 %v284_v9 }
  0x72   :  { %461 = vmatmul.f32.gmra.mxu3 %v288_v11  ;;  %223 = vmatmul.bf16.gmra.mxu0 %v657_v10 }
  0x74   :  { %384 = vmatmul.f32.gmra.mxu1 %v316_v12 }
  0x79   :  { %452 = vmatmul.f32.gmra.mxu2 %v285_v13 }
  0x7a   :  { %464 = vmatmul.f32.gmra.mxu3 %v289_v14 }
  0x7c   :  { %387 = vmatmul.f32.gmra.mxu1 %v317_v15 }
  0x9f   :  { %v199_v16 = vpop.f32.mrf.mxu0 }
  0xa1   :  { %v355_v17 = vpop.f32.mrf.mxu1 }
  0xa4   :  { %v420_v19 = vpop.f32.mrf.mxu2 }
  0xa5   :  { %v421_v20 = vadd.f32 %v420_v19, %v355_v17  ;;  %v1102_v21 = vpop.f32.mrf.mxu3 }
  0xa7   :  { %v472_v22 = vadd.f32 %v1100_v18, %v421_v20  ;;  %v201_v23 = vpop.f32.mrf.mxu0 }
  0xa9   :  { %v504_v24 = vadd.f32 %v472_v22, %v199_v16  ;;  %v358_v25 = vpop.f32.mrf.mxu1 }
  0xab   :  { %vm520_vm0 = vcmp.gt.f32.partialorder %v504_v24, 0.0  ;;  %v536_v26 = vmul.f32 0.01, %v504_v24 }
  0xac   :  { %v423_v27 = vpop.f32.mrf.mxu2 }
  0xad   :  { %v552_v28 = vsel %vm520_vm0, %v504_v24, %v536_v26  ;;  %v424_v29 = vadd.f32 %v423_v27, %v358_v25  ;;  %v1105_v30 = vpop.f32.mrf.mxu3 }
  0xae   :  { %568 = vst [vmem:[%s1188_s7] sm:$0xff] %v552_v28 }
  0xaf   :  { %v473_v31 = vadd.f32 %v1100_v18, %v424_v29  ;;  %v204_v32 = vpop.f32.mrf.mxu0 }
  0xb1   :  { %v505_v33 = vadd.f32 %v473_v31, %v201_v23  ;;  %v361_v34 = vpop.f32.mrf.mxu1 }
  0xb3   :  { %vm521_vm1 = vcmp.gt.f32.partialorder %v505_v33, 0.0  ;;  %v537_v35 = vmul.f32 0.01, %v505_v33 }
  0xb4   :  { %v426_v36 = vpop.f32.mrf.mxu2 }
  0xb5   :  { %v553_v37 = vsel %vm521_vm1, %v505_v33, %v537_v35  ;;  %v427_v38 = vadd.f32 %v426_v36, %v361_v34  ;;  %v1111_v39 = vpop.f32.mrf.mxu3 }
  0xb6   :  { %569 = vst [vmem:[%s1188_s7 + $0x8] sm:$0xff] %v553_v37 }
  0xb7   :  { %v474_v40 = vadd.f32 %v1100_v18, %v427_v38  ;;  %v206_v41 = vpop.f32.mrf.mxu0 }
  0xb9   :  { %v506_v42 = vadd.f32 %v474_v40, %v204_v32  ;;  %v364_v43 = vpop.f32.mrf.mxu1 }
  0xbb   :  { %vm522_vm2 = vcmp.gt.f32.partialorder %v506_v42, 0.0  ;;  %v538_v44 = vmul.f32 0.01, %v506_v42 }
  0xbc   :  { %v429_v45 = vpop.f32.mrf.mxu2 }
  0xbd   :  { %v554_v46 = vsel %vm522_vm2, %v506_v42, %v538_v44  ;;  %v430_v47 = vadd.f32 %v429_v45, %v364_v43  ;;  %v1117_v48 = vpop.f32.mrf.mxu3 }
  0xbe   :  { %570 = vst [vmem:[%s1188_s7 + $0x10] sm:$0xff] %v554_v46 }
  0xbf   :  { %v475_v49 = vadd.f32 %v1100_v18, %v430_v47  ;;  %v209_v50 = vpop.f32.mrf.mxu0 }
  0xc1   :  { %v507_v51 = vadd.f32 %v475_v49, %v206_v41  ;;  %v367_v52 = vpop.f32.mrf.mxu1 }
  0xc3   :  { %vm523_vm3 = vcmp.gt.f32.partialorder %v507_v51, 0.0  ;;  %v539_v53 = vmul.f32 0.01, %v507_v51 }
  0xc4   :  { %v432_v54 = vpop.f32.mrf.mxu2 }
  0xc5   :  { %v555_v55 = vsel %vm523_vm3, %v507_v51, %v539_v53  ;;  %v433_v56 = vadd.f32 %v432_v54, %v367_v52  ;;  %v391_v57 = vpop.f32.mrf.mxu3 }
  0xc6   :  { %571 = vst [vmem:[%s1188_s7 + $0x18] sm:$0xff] %v555_v55 }
  0xc7   :  { %v476_v58 = vadd.f32 %v1100_v18, %v433_v56  ;;  %v211_v59 = vpop.f32.mrf.mxu0 }
  0xc9   :  { %v508_v60 = vadd.f32 %v476_v58, %v209_v50  ;;  %v370_v61 = vpop.f32.mrf.mxu1 }
  0xcb   :  { %vm524_vm4 = vcmp.gt.f32.partialorder %v508_v60, 0.0  ;;  %v540_v62 = vmul.f32 0.01, %v508_v60 }
  0xcc   :  { %v435_v63 = vpop.f32.mrf.mxu2 }
  0xcd   :  { %v556_v0 = vsel %vm524_vm4, %v508_v60, %v540_v62  ;;  %v436_v1 = vadd.f32 %v435_v63, %v370_v61  ;;  %v394_v2 = vpop.f32.mrf.mxu3 }
  0xce   :  { %572 = vst [vmem:[%s1188_s7 + $0x20] sm:$0xff] %v556_v0 }
  0xcf   :  { %v477_v3 = vadd.f32 %v1100_v18, %v436_v1  ;;  %v214_v4 = vpop.f32.mrf.mxu0 }
  0xd1   :  { %v509_v5 = vadd.f32 %v477_v3, %v211_v59  ;;  %v373_v6 = vpop.f32.mrf.mxu1 }
  0xd3   :  { %vm525_vm5 = vcmp.gt.f32.partialorder %v509_v5, 0.0  ;;  %v541_v7 = vmul.f32 0.01, %v509_v5 }
  0xd4   :  { %v438_v8 = vpop.f32.mrf.mxu2 }
  0xd5   :  { %v557_v9 = vsel %vm525_vm5, %v509_v5, %v541_v7  ;;  %v439_v10 = vadd.f32 %v438_v8, %v373_v6  ;;  %v397_v11 = vpop.f32.mrf.mxu3 }
  0xd6   :  { %573 = vst [vmem:[%s1188_s7 + $0x28] sm:$0xff] %v557_v9 }
  0xd7   :  { %v478_v12 = vadd.f32 %v1100_v18, %v439_v10  ;;  %v216_v13 = vpop.f32.mrf.mxu0 }
  0xd9   :  { %v510_v14 = vadd.f32 %v478_v12, %v214_v4  ;;  %v376_v15 = vpop.f32.mrf.mxu1 }
  0xdb   :  { %vm526_vm6 = vcmp.gt.f32.partialorder %v510_v14, 0.0  ;;  %v542_v16 = vmul.f32 0.01, %v510_v14 }
  0xdc   :  { %v441_v17 = vpop.f32.mrf.mxu2 }
  0xdd   :  { %v558_v19 = vsel %vm526_vm6, %v510_v14, %v542_v16  ;;  %v442_v20 = vadd.f32 %v441_v17, %v376_v15  ;;  %v1135_v22 = vpop.f32.mrf.mxu3 }
  0xde   :  { %574 = vst [vmem:[%s1188_s7 + $0x30] sm:$0xff] %v558_v19 }
  0xdf   :  { %v479_v23 = vadd.f32 %v1100_v18, %v442_v20  ;;  %v219_v26 = vpop.f32.mrf.mxu0 }
  0xe1   :  { %v511_v24 = vadd.f32 %v479_v23, %v216_v13  ;;  %v379_v25 = vpop.f32.mrf.mxu1 }
  0xe3   :  { %vm527_vm7 = vcmp.gt.f32.partialorder %v511_v24, 0.0  ;;  %v543_v27 = vmul.f32 0.01, %v511_v24 }
  0xe4   :  { %v444_v28 = vpop.f32.mrf.mxu2 }
  0xe5   :  { %v559_v29 = vsel %vm527_vm7, %v511_v24, %v543_v27  ;;  %v445_v31 = vadd.f32 %v444_v28, %v379_v25  ;;  %v456_v32 = vpop.f32.mrf.mxu3 }
  0xe6   :  { %575 = vst [vmem:[%s1188_s7 + $0x38] sm:$0xff] %v559_v29  ;;  %v457_v33 = vadd.f32 %v456_v32, %v391_v57 }
  0xe7   :  { %v480_v34 = vadd.f32 %v1100_v18, %v445_v31  ;;  %v221_v42 = vpop.f32.mrf.mxu0 }
  0xe8   :  { %v484_v35 = vadd.f32 %v1100_v18, %v457_v33 }
  0xe9   :  { %v512_v36 = vadd.f32 %v480_v34, %v219_v26  ;;  %v382_v37 = vpop.f32.mrf.mxu1 }
  0xea   :  { %v516_v38 = vadd.f32 %v484_v35, %v1102_v21 }
  0xeb   :  { %vm528_vm8 = vcmp.gt.f32.partialorder %v512_v36, 0.0  ;;  %v544_v40 = vmul.f32 0.01, %v512_v36 }
  0xec   :  { %vm532_vm9 = vcmp.gt.f32.partialorder %v516_v38, 0.0  ;;  %v548_v41 = vmul.f32 0.01, %v516_v38  ;;  %v447_v43 = vpop.f32.mrf.mxu2 }
  0xed   :  { %v560_v44 = vsel %vm528_vm8, %v512_v36, %v544_v40  ;;  %v448_v45 = vadd.f32 %v447_v43, %v382_v37  ;;  %v459_v46 = vpop.f32.mrf.mxu3 }
  0xee   :  { %576 = vst [vmem:[%s1188_s7 + $0x40] sm:$0xff] %v560_v44  ;;  %v564_v47 = vsel %vm532_vm9, %v516_v38, %v548_v41  ;;  %v460_v49 = vadd.f32 %v459_v46, %v394_v2 }
  0xef   :  { %580 = vst [vmem:[%s1188_s7 + $0x60] sm:$0xff] %v564_v47  ;;  %v481_v21 = vadd.f32 %v1100_v18, %v448_v45  ;;  %v224_v61 = vpop.f32.mrf.mxu0 }
  0xf0   :  { %v485_v50 = vadd.f32 %v1100_v18, %v460_v49 }
  0xf1   :  { %v513_v51 = vadd.f32 %v481_v21, %v221_v42  ;;  %v385_v52 = vpop.f32.mrf.mxu1 }
  0xf2   :  { %v517_v53 = vadd.f32 %v485_v50, %v1105_v30 }
  0xf3   :  { %vm529_vm10 = vcmp.gt.f32.partialorder %v513_v51, 0.0  ;;  %v545_v54 = vmul.f32 0.01, %v513_v51 }
  0xf4   :  { %vm533_vm11 = vcmp.gt.f32.partialorder %v517_v53, 0.0  ;;  %v549_v55 = vmul.f32 0.01, %v517_v53  ;;  %v450_v56 = vpop.f32.mrf.mxu2 }
  0xf5   :  { %v561_v57 = vsel %vm529_vm10, %v513_v51, %v545_v54  ;;  %v451_v58 = vadd.f32 %v450_v56, %v385_v52  ;;  %v462_v59 = vpop.f32.mrf.mxu3 }
  0xf6   :  { %577 = vst [vmem:[%s1188_s7 + $0x48] sm:$0xff] %v561_v57  ;;  %v565_v60 = vsel %vm533_vm11, %v517_v53, %v549_v55  ;;  %v463_v62 = vadd.f32 %v462_v59, %v397_v11 }
  0xf7   :  { %581 = vst [vmem:[%s1188_s7 + $0x68] sm:$0xff] %v565_v60  ;;  %v482_v30 = vadd.f32 %v1100_v18, %v451_v58  ;;  %v226_v11 = vpop.f32.mrf.mxu0 }
  0xf8   :  { %v486_v63 = vadd.f32 %v1100_v18, %v463_v62 }
  0xf9   :  { %v514_v0 = vadd.f32 %v482_v30, %v224_v61  ;;  %v388_v2 = vpop.f32.mrf.mxu1 }
  0xfa   :  { %v518_v1 = vadd.f32 %v486_v63, %v1111_v39 }
  0xfb   :  { %vm530_vm12 = vcmp.gt.f32.partialorder %v514_v0, 0.0  ;;  %v546_v3 = vmul.f32 0.01, %v514_v0 }
  0xfc   :  { %vm534_vm13 = vcmp.gt.f32.partialorder %v518_v1, 0.0  ;;  %v550_v4 = vmul.f32 0.01, %v518_v1  ;;  %v453_v5 = vpop.f32.mrf.mxu2 }
  0xfd   :  { %v562_v6 = vsel %vm530_vm12, %v514_v0, %v546_v3  ;;  %v454_v7 = vadd.f32 %v453_v5, %v388_v2  ;;  %v465_v8 = vpop.f32.mrf.mxu3 }
  0xfe   :  { %578 = vst [vmem:[%s1188_s7 + $0x50] sm:$0xff] %v562_v6  ;;  %v566_v9 = vsel %vm534_vm13, %v518_v1, %v550_v4  ;;  %v466_v10 = vadd.f32 %v465_v8, %v1135_v22 }
  0xff   :  { %582 = vst [vmem:[%s1188_s7 + $0x70] sm:$0xff] %v566_v9  ;;  %v483_v39 = vadd.f32 %v1100_v18, %v454_v7 }
 0x100   :  { %v487_v12 = vadd.f32 %v1100_v18, %v466_v10 }
 0x101   :  { %v515_v13 = vadd.f32 %v483_v39, %v226_v11 }
 0x102   :  { %v519_v14 = vadd.f32 %v487_v12, %v1117_v48 }
 0x103   :  { %vm531_vm14 = vcmp.gt.f32.partialorder %v515_v13, 0.0  ;;  %v547_v15 = vmul.f32 0.01, %v515_v13 }
 0x104   :  { %vm535_vm15 = vcmp.gt.f32.partialorder %v519_v14, 0.0  ;;  %v551_v16 = vmul.f32 0.01, %v519_v14 }
 0x105   :  { %v563_v17 = vsel %vm531_vm14, %v515_v13, %v547_v15 }
 0x106   :  { %579 = vst [vmem:[%s1188_s7 + $0x58] sm:$0xff] %v563_v17  ;;  %v567_v19 = vsel %vm535_vm15, %v519_v14, %v551_v16 }
 0x107   :  { %583 = vst [vmem:[%s1188_s7 + $0x78] sm:$0xff] %v567_v19 }

// kernel: gnn_forward.9
= control target key start
LH: loop header
LB: loop body
LE: loop exit
PB: predicated region body
PF: predicated region fallthrough
CT: control target
= control target key end

     0   :  { %v29_v2 = vlaneseq  ;;  %v341_v3 = vmov 0.0   ;;  %s586_s0 = inlined_call_operand.<no memory space> [shape: s32[1], index: 0, kind: input, shape index: {}]   ;;  %s587_s1 = inlined_call_operand.vmem [shape: f32[128,128], index: 1, kind: input, shape index: {}]   ;;  %s588_s2 = inlined_call_operand.vmem [shape: f32[128,128], index: 2, kind: input, shape index: {}]   ;;  %s589_s3 = inlined_call_operand.vmem [shape: f32[1,128], index: 3, kind: input, shape index: {}]   ;;  %s590_s4 = inlined_call_operand.vmem [shape: f32[128,128], index: 4, kind: input, shape index: {}]   ;;  %s591_s5 = inlined_call_operand.vmem [shape: f32[1,128], index: 5, kind: input, shape index: {}]   ;;  %s592_s6 = inlined_call_operand.hbm [shape: f32[1,128], index: 6, kind: output, shape index: {}]  }
   0x1   :  { %s173_s23 = scvt.s32.f32 %s586_s0  ;;  %v208_v0 = vld [vmem:[%s588_s2 + $0x78] sm:$0xff]  ;;  %v207_v1 = vld [vmem:[%s588_s2 + $0x70] sm:$0xff]  ;;  %27 = vst [vmem:[#allocation2] sm:$0x1] %v341_v3  ;;  %v206_v5 = vld [vmem:[%s588_s2 + $0x68] sm:$0xff]  ;;  %v406_v11 = vstv %s586_s0 }
   0x2   :  { %210 = vmatpush.msra.mxu0 %v208_v0  ;;  %v391_v6 = vshrl.u32 %v29_v2, 7  ;;  %v205_v7 = vld [vmem:[%s588_s2 + $0x60] sm:$0xff]  ;;  %v204_v8 = vld [vmem:[%s588_s2 + $0x58] sm:$0xff]  ;;  %v203_v10 = vld [vmem:[%s588_s2 + $0x50] sm:$0xff] }
   0x3   :  { %v174_v4 = vstv %s173_s23  ;;  %v202_v15 = vld [vmem:[%s588_s2 + $0x48] sm:$0xff]  ;;  %v81_v18 = vld [vmem:[%s587_s1] sm:$0xff] }
   0x4   :  { %309 = vrcp.f32 %v174_v4  ;;  %211 = vmatpush.msra.mxu0 %v207_v1  ;;  %v31_v9 = vadd.s32 8, %v391_v6  ;;  %v32_v13 = vadd.s32 16, %v391_v6  ;;  %v186_v16 = vand.u32 2147483648, %v174_v4  ;;  %v82_v19 = vld [vmem:[%s587_s1 + $0x8] sm:$0xff]  ;;  %v201_v22 = vld [vmem:[%s588_s2 + $0x40] sm:$0xff] }
   0x5   :  { %v33_v17 = vadd.s32 24, %v391_v6  ;;  %vm65_vm0 = vcmp.lt.s32.totalorder %v391_v6, %v406_v11  ;;  %vm180_vm2 = vweird.f32 %v174_v4  ;;  %v184_v21 = vand.u32 2147483647, %v174_v4 }
   0x6   :  { %212 = vmatpush.msra.mxu0 %v206_v5  ;;  %vm66_vm1 = vcmp.lt.s32.totalorder %v31_v9, %v406_v11 }
   0x8   :  { %213 = vmatpush.msra.mxu0 %v205_v7 }
   0xa   :  { %v310_v12 = vpop.eup %309  ;;  %214 = vmatpush.msra.mxu0 %v204_v8 }
   0xb   :  { %v176_v14 = vmul.f32 %v310_v12, %v174_v4  ;;  %vm181_vm3 = vweird.f32 %v310_v12 }
   0xc   :  { %215 = vmatpush.msra.mxu0 %v203_v10 }
   0xd   :  { %v177_v20 = vsub.f32 1.0, %v176_v14 }
   0xe   :  { %12 = vsyncpa [#allocation6], 0  ;;  %216 = vmatpush.msra.mxu0 %v202_v15  ;;  %v34_v23 = vadd.s32 32, %v391_v6  ;;  %vm67_vm4 = vcmp.lt.s32.totalorder %v32_v13, %v406_v11  ;;  %v83_v24 = vld [vmem:[%s587_s1 + $0x10] sm:$0xff]  ;;  %v200_v26 = vld [vmem:[%s588_s2 + $0x38] sm:$0xff]  ;;  %v129_v27 = vsel %vm65_vm0, %v81_v18, 0.0  ;;  %vm68_vm6 = vcmp.lt.s32.totalorder %v33_v17, %v406_v11 }
   0xf   :  { %v178_v25 = vmul.f32 %v310_v12, %v177_v20  ;;  %v130_v28 = vsel %vm66_vm1, %v82_v19, 0.0  ;;  %vm438_vm5 = vmor %vm180_vm2, %vm181_vm3  ;;  %v187_v30 = vor.u32 1.1754944e-38, %v186_v16  ;;  %v35_v31 = vadd.s32 40, %v391_v6  ;;  %v84_v32 = vld [vmem:[%s587_s1 + $0x18] sm:$0xff]  ;;  %v199_v34 = vld [vmem:[%s588_s2 + $0x30] sm:$0xff]  ;;  %s296_s24 = sshll.u32 %s592_s6, 4  ;;  %s297_s24 = int_to_ptr.hbm [resolvable:$true] %s296_s24 }
  0x10   :  { %217 = vmatpush.msra.mxu0 %v201_v22  ;;  %vm185_vm7 = vcmp.eq.f32.partialorder %v184_v21, 8.507059e+37  ;;  %v131_v35 = vsel %vm67_vm4, %v83_v24, 0.0  ;;  %v36_v36 = vadd.s32 48, %v391_v6  ;;  %vm69_vm8 = vcmp.lt.s32.totalorder %v34_v23, %v406_v11  ;;  %v85_v37 = vld [vmem:[%s587_s1 + $0x20] sm:$0xff]  ;;  %v198_v40 = vld [vmem:[%s588_s2 + $0x28] sm:$0xff]  ;;  %v87_v49 = vld [vmem:[%s587_s1 + $0x30] sm:$0xff] }
  0x11   :  { %v179_v33 = vadd.f32 %v310_v12, %v178_v25  ;;  %v146_v38 = vadd.f32 %v130_v28, %v129_v27  ;;  %v132_v41 = vsel %vm68_vm6, %v84_v32, 0.0  ;;  %v37_v43 = vadd.s32 56, %v391_v6  ;;  %v86_v44 = vld [vmem:[%s587_s1 + $0x28] sm:$0xff]  ;;  %v197_v46 = vld [vmem:[%s588_s2 + $0x20] sm:$0xff]  ;;  %v196_v51 = vld [vmem:[%s588_s2 + $0x18] sm:$0xff] }
  0x12   :  { %218 = vmatpush.msra.mxu0 %v200_v26  ;;  %vm70_vm9 = vcmp.lt.s32.totalorder %v35_v31, %v406_v11  ;;  %v133_v47 = vsel %vm69_vm8, %v85_v37, 0.0  ;;  %v38_v48 = vadd.s32 64, %v391_v6  ;;  %vm71_vm10 = vcmp.lt.s32.totalorder %v36_v36, %v406_v11  ;;  %v88_v54 = vld [vmem:[%s587_s1 + $0x38] sm:$0xff]  ;;  %v195_v56 = vld [vmem:[%s588_s2 + $0x10] sm:$0xff]  ;;  %v89_v59 = vld [vmem:[%s587_s1 + $0x40] sm:$0xff] }
  0x13   :  { %v183_v39 = vsel %vm438_vm5, %v310_v12, %v179_v33  ;;  %v147_v45 = vadd.f32 %v146_v38, %v131_v35  ;;  %v134_v52 = vsel %vm70_vm9, %v86_v44, 0.0  ;;  %v39_v53 = vadd.s32 72, %v391_v6  ;;  %v90_v63 = vld [vmem:[%s587_s1 + $0x48] sm:$0xff]  ;;  %v91_v4 = vld [vmem:[%s587_s1 + $0x50] sm:$0xff]  ;;  %v92_v9 = vld [vmem:[%s587_s1 + $0x58] sm:$0xff] }
  0x14   :  { %v188_v42 = vsel %vm185_vm7, %v187_v30, %v183_v39  ;;  %219 = vmatpush.msra.mxu0 %v199_v34  ;;  %vm72_vm11 = vcmp.lt.s32.totalorder %v37_v43, %v406_v11  ;;  %v135_v57 = vsel %vm71_vm10, %v87_v49, 0.0  ;;  %v40_v58 = vadd.s32 80, %v391_v6  ;;  %v93_v14 = vld [vmem:[%s587_s1 + $0x60] sm:$0xff]  ;;  %v94_v18 = vld [vmem:[%s587_s1 + $0x68] sm:$0xff]  ;;  %v95_v21 = vld [vmem:[%s587_s1 + $0x70] sm:$0xff] }
  0x15   :  { %305 = vpush %v188_v42  ;;  %v148_v50 = vadd.f32 %v147_v45, %v132_v41  ;;  %vm73_vm12 = vcmp.lt.s32.totalorder %v38_v48, %v406_v11  ;;  %v136_v61 = vsel %vm72_vm11, %v88_v54, 0.0  ;;  %v41_v62 = vadd.s32 88, %v391_v6  ;;  %v194_v23 = vld [vmem:[%s588_s2 + $0x8] sm:$0xff]  ;;  %v96_v24 = vld [vmem:[%s587_s1 + $0x78] sm:$0xff]  ;;  %v193_v26 = vld [vmem:[%s588_s2] sm:$0xff] }
  0x16   :  { %220 = vmatpush.msra.mxu0 %v198_v40  ;;  %vm74_vm13 = vcmp.lt.s32.totalorder %v39_v53, %v406_v11  ;;  %v137_v1 = vsel %vm73_vm12, %v89_v59, 0.0  ;;  %v42_v3 = vadd.s32 96, %v391_v6  ;;  %vm75_vm14 = vcmp.lt.s32.totalorder %v40_v58, %v406_v11  ;;  %v248_v29 = vld [vmem:[%s590_s4 + $0x78] sm:$0xff]  ;;  %v246_v32 = vld [vmem:[%s590_s4 + $0x68] sm:$0xff]  ;;  %v245_v34 = vld [vmem:[%s590_s4 + $0x60] sm:$0xff] }
  0x17   :  { %v149_v55 = vadd.f32 %v148_v50, %v133_v47  ;;  %v138_v7 = vsel %vm74_vm13, %v90_v63, 0.0  ;;  %v43_v8 = vadd.s32 104, %v391_v6  ;;  %vm76_vm15 = vcmp.lt.s32.totalorder %v41_v62, %v406_v11  ;;  %250 = vmatpush.msra.mxu1 %v248_v29  ;;  %v244_v36 = vld [vmem:[%s590_s4 + $0x58] sm:$0xff]  ;;  %v243_v38 = vld [vmem:[%s590_s4 + $0x50] sm:$0xff]  ;;  %v242_v40 = vld [vmem:[%s590_s4 + $0x48] sm:$0xff] }
  0x18   :  { %221 = vmatpush.msra.mxu0 %v197_v46  ;;  %v139_v12 = vsel %vm75_vm14, %v91_v4, 0.0  ;;  %v44_v13 = vadd.s32 112, %v391_v6  ;;  %vm77_vm0 = vcmp.lt.s32.totalorder %v42_v3, %v406_v11  ;;  %v140_v16 = vsel %vm76_vm15, %v92_v9, 0.0  ;;  %v241_v42 = vld [vmem:[%s590_s4 + $0x40] sm:$0xff]  ;;  %v240_v44 = vld [vmem:[%s590_s4 + $0x38] sm:$0xff]  ;;  %v239_v47 = vld [vmem:[%s590_s4 + $0x30] sm:$0xff] }
  0x19   :  { %v150_v60 = vadd.f32 %v149_v55, %v134_v52  ;;  %v45_v17 = vadd.s32 120, %v391_v6  ;;  %vm78_vm1 = vcmp.lt.s32.totalorder %v43_v8, %v406_v11  ;;  %v141_v20 = vsel %vm77_vm0, %v93_v14, 0.0  ;;  %v145_v45 = vld [vmem:[#allocation2] sm:$0x1]  ;;  %v238_v49 = vld [vmem:[%s590_s4 + $0x28] sm:$0xff]  ;;  %v235_v55 = vld [vmem:[%s590_s4 + $0x10] sm:$0xff] }
  0x1a   :  { %222 = vmatpush.msra.mxu0 %v196_v51  ;;  %vm79_vm2 = vcmp.lt.s32.totalorder %v44_v13, %v406_v11  ;;  %v142_v6 = vsel %vm78_vm1, %v94_v18, 0.0  ;;  %v237_v50 = vld [vmem:[%s590_s4 + $0x20] sm:$0xff]  ;;  %v236_v51 = vld [vmem:[%s590_s4 + $0x18] sm:$0xff]  ;;  %v271_v63 = vand.u32 127, %v29_v2  ;;  %vm274_vm6 = vcmask 1040384  }
  0x1b   :  { %v151_v0 = vadd.f32 %v150_v60, %v135_v57  ;;  %vm80_vm3 = vcmp.lt.s32.totalorder %v45_v17, %v406_v11  ;;  %v143_v27 = vsel %vm79_vm2, %v95_v21, 0.0  ;;  %v247_v11 = vld [vmem:[%s590_s4 + $0x70] sm:$0xff]  ;;  %v233_v57 = vld [vmem:[%s590_s4] sm:$0xff] }
  0x1c   :  { %223 = vmatpush.msra.mxu0 %v195_v56  ;;  %v144_v30 = vsel %vm80_vm3, %v96_v24, 0.0  ;;  %251 = vmatpush.msra.mxu1 %v247_v11  ;;  %v234_v56 = vld [vmem:[%s590_s4 + $0x8] sm:$0xff]  ;;  %v209_v58 = vld [vmem:[%s589_s3] sm:$0x1]  ;;  %vm272_vm5 = vcmp.lt.s32.totalorder %v271_v63, 3  ;;  %s342_s3 = smov [#allocation5]  }
  0x1d   :  { %v152_v5 = vadd.f32 %v151_v0, %v136_v61  ;;  %v249_v0 = vld [vmem:[%s591_s5] sm:$0x1]  ;;  %s294_s4 = sshll.u32 %s342_s3, 4  ;;  %s295_s4 = int_to_ptr.vmem [resolvable:$true] %s294_s4 }
  0x1e   :  { %224 = vmatpush.msra.mxu0 %v194_v23  ;;  %252 = vmatpush.msra.mxu1 %v246_v32 }
  0x1f   :  { %v153_v10 = vadd.f32 %v152_v5, %v137_v1 }
  0x20   :  { %225 = vmatpush.msra.mxu0 %v193_v26  ;;  %253 = vmatpush.msra.mxu1 %v245_v34 }
  0x21   :  { %v154_v15 = vadd.f32 %v153_v10, %v138_v7 }
  0x22   :  { %254 = vmatpush.msra.mxu1 %v244_v36 }
  0x23   :  { %v155_v19 = vadd.f32 %v154_v15, %v139_v12 }
  0x24   :  { %255 = vmatpush.msra.mxu1 %v243_v38 }
  0x25   :  { %v156_v22 = vadd.f32 %v155_v19, %v140_v16 }
  0x26   :  { %256 = vmatpush.msra.mxu1 %v242_v40 }
  0x27   :  { %v157_v25 = vadd.f32 %v156_v22, %v141_v20 }
  0x28   :  { %257 = vmatpush.msra.mxu1 %v241_v42 }
  0x29   :  { %v158_v28 = vadd.f32 %v157_v25, %v142_v6 }
  0x2a   :  { %258 = vmatpush.msra.mxu1 %v240_v44 }
  0x2b   :  { %v159_v31 = vadd.f32 %v158_v28, %v143_v27 }
  0x2c   :  { %259 = vmatpush.msra.mxu1 %v239_v47 }
  0x2d   :  { %v160_v33 = vadd.f32 %v159_v31, %v144_v30 }
  0x2e   :  { %260 = vmatpush.msra.mxu1 %v238_v49 }
  0x2f   :  { %v161_v35 = vrot.slane %v160_v33, 4 }
  0x30   :  { %261 = vmatpush.msra.mxu1 %v237_v50 }
  0x31   :  { %v162_v37 = vadd.f32 %v161_v35, %v160_v33 }
  0x32   :  { %262 = vmatpush.msra.mxu1 %v236_v51 }
  0x33   :  { %v163_v39 = vrot.slane %v162_v37, 2 }
  0x34   :  { %263 = vmatpush.msra.mxu1 %v235_v55 }
  0x35   :  { %v164_v41 = vadd.f32 %v163_v39, %v162_v37 }
  0x36   :  { %264 = vmatpush.msra.mxu1 %v234_v56 }
  0x37   :  { %v165_v43 = vrot.slane %v164_v41, 1 }
  0x38   :  { %265 = vmatpush.msra.mxu1 %v233_v57 }
  0x39   :  { %v166_v46 = vadd.f32 %v165_v43, %v164_v41 }
  0x3b   :  { %v167_v48 = vadd.f32 %v166_v46, %v145_v45 }
  0x3d   :  { %168 = vst [vmem:[#allocation2] sm:$0x1] %v167_v48 }
  0x44   :  { %v190_v52 = vld [vmem:[#allocation2] sm:$0x1] }
  0x46   :  { %s306_s15 = spop %305 }
  0x47   :  { %v191_v53 = vstv %s306_s15 }
  0x48   :  { %v192_v54 = vmul.f32 %v191_v53, %v190_v52 }
  0x4a   :  { %226 = vmatmul.f32.vlgmr.msra.gmra.mxu0 %v192_v54 }
  0xc7   :  { %v227_v59 = vpop.f32.mrf.mxu0 }
  0xc8   :  { %v228_v60 = vadd.f32 %v227_v59, %v209_v58 }
  0xca   :  { %vm230_vm4 = vcmp.gt.f32.partialorder %v228_v60, 0.0  ;;  %v231_v61 = vmul.f32 0.01, %v228_v60 }
  0xcc   :  { %v232_v62 = vsel %vm230_vm4, %v228_v60, %v231_v61 }
  0xcd   :  { %266 = vmatmul.f32.vlgmr.msra.gmra.mxu1 %v232_v62 }
 0x14a   :  { %v267_v1 = vpop.f32.mrf.mxu1 }
 0x14b   :  { %v268_v3 = vadd.f32 %v267_v1, %v249_v0 }
 0x14d   :  { %v273_v4 = vsel %vm272_vm5, %v268_v3, -1e+30 }
 0x14e   :  { %v275_v5 = vsel %vm274_vm6, %v273_v4, -inf }
 0x14f   :  { %276 = vmax.xlane.f32.xlu0 %v275_v5 }
 0x1c2   :  { %v277_v7 = vpop.xlane.xlu0 %276 }
 0x1c3   :  { %v278_v8 = vsub.f32 %v273_v4, %v277_v7 }
 0x1c5   :  { %v279_v9 = vmul.f32 1.442695, %v278_v8 }
 0x1c7   :  { %311 = vpow2.f32 %v279_v9 }
 0x1cd   :  { %v312_v10 = vpop.eup %311 }
 0x1ce   :  { %v281_v12 = vsel %vm274_vm6, %v312_v10, 0.0 }
 0x1cf   :  { %282 = vadd.xlane.f32.xlu0 %v281_v12 }
 0x242   :  { %v283_v13 = vpop.xlane.xlu0 %282 }
 0x243   :  { %313 = vlog2.f32 %v283_v13 }
 0x249   :  { %v314_v2 = vpop.eup %313 }
 0x24a   :  { %v285_v14 = vmul.f32 0.6931472, %v314_v2 }
 0x24c   :  { %v286_v15 = vadd.f32 %v285_v14, %v277_v7 }
 0x24e   :  { %v287_v16 = vsub.f32 %v273_v4, %v286_v15 }
 0x250   :  { %288 = vst [vmem:[#allocation5] sm:$0x1] %v287_v16 }
 0x251   :  { %299 = dma.vmem_to_hbm [thread:$0]  %s295_s4, 16, %s297_s24, [#allocation6]  }
 0x252   :  { %339 = dma.done.wait [#allocation6], 16  }
 0x253   :  { %340 = vsyncadd [#allocation6], 4294967280 }
 0x254   :  { %304 = vsyncpa [#allocation6], 1 }

</bundles_post_ra>
